<compile_context>
chip_gen: v7x
topology: tpu7x:2x2x1
jax: 0.10.0
libtpu: 0.0.40
codegen_flags: <defaults>
</compile_context>

<pallas_src>
import functools

import numpy as np
import jax
import jax.numpy as jnp
from jax.experimental import pallas as pl
from jax.experimental.pallas import tpu as pltpu

# Keep wrapper / reference matmuls in true f32 so the f32-accumulating kernel
# and the pure-JAX reference agree tightly.
jax.config.update("jax_default_matmul_precision", "float32")


# ----------------------------------------------------------------------------
# Synthetic dynamics (deterministic, in-script).
# ----------------------------------------------------------------------------
class KinematicBicycle:
    dt = 0.1
    state_dim = 4          # [px, py, psi, v]
    ctrl_dim = 2           # [a, delta]
    a_min, a_max = -3.0, 3.0
    delta_min, delta_max = -0.344, 0.344
    wheelbase = 1.0


# ----------------------------------------------------------------------------
# Pallas kernel: ONLY the serial LSTM recurrence.  One invocation, T-step
# bounded-unroll loop, (h, c) carried in registers, outputs flushed once.
# ----------------------------------------------------------------------------
def _lstm_recurrence_kernel(
    # inputs
    xg_ref,                    # [T, bs_p, 4H]  fused x@W_ih + b (gate order i|f|g|o)
    whh_ref,                   # [H, 4H]        W_hh^T, lane-dense
    h0_ref, c0_ref,            # [bs_p, H]
    # outputs
    o_ref,                     # [T, bs_p, H]
    hN_ref, cN_ref,            # [bs_p, H]
    *, T, H,
):
    bs_p = h0_ref.shape[0]

    # Loop-invariant recurrent weight: load once so the MXU RHS can stay staged.
    whh = whh_ref[...]                                         # [H, 4H]

    # Lane-dependent pre/post factors implementing, in ONE tanh pass:
    #   lanes [0,2H) & [3H,4H)  (i, f, o gates): sigmoid(x) = 0.5*tanh(0.5*x)+0.5
    #   lanes [2H,3H)           (g gate)       : tanh(x)    = 1.0*tanh(1.0*x)+0.0
    # (post-mul happens to equal the pre-scale for this layout).  Hoisted out
    # of the time loop — JAX does not CSE broadcast_in_dim.
    lane = jax.lax.broadcasted_iota(jnp.int32, (bs_p, 4 * H), 1)
    is_g = jnp.logical_and(lane >= 2 * H, lane < 3 * H)
    pre = jnp.where(is_g, 1.0, 0.5).astype(jnp.float32)        # also the post-mul
    post_add = jnp.where(is_g, 0.0, 0.5).astype(jnp.float32)

    def step(t, carry):
        h, c = carry                                            # [bs_p, H] each
        # One lane-dense matmul per step: [bs_p, H] @ [H, 4H] -> [bs_p, 4H].
        gates = xg_ref[t] + jnp.dot(h, whh, preferred_element_type=jnp.float32)
        act = pre * jnp.tanh(pre * gates) + post_add            # all 4 gates, 1 EUP pass
        i_g = act[:, 0:H]                                       # lane offset 0 (free)
        f_g = act[:, H:2 * H]                                   # single XLU rotates
        g_g = act[:, 2 * H:3 * H]
        o_g = act[:, 3 * H:4 * H]
        c_new = f_g * c + i_g * g_g
        h_new = o_g * jnp.tanh(c_new)
        o_ref[t] = h_new
        return (h_new, c_new)

    h_last, c_last = jax.lax.fori_loop(
        0, T, step, (h0_ref[...], c0_ref[...]), unroll=min(T, 8))
    hN_ref[...] = h_last
    cN_ref[...] = c_last


# ----------------------------------------------------------------------------
# Wrapper: non-recurrent math in plain JAX + one pallas_call for the scan.
# ----------------------------------------------------------------------------
def stl_policy_forward(x0, params, stats, dyn=KinematicBicycle):
    """x0: [bs, T, state_dim] standardized state trajectory (batch-first).

    Returns (o, u, x_next, (h_n, c_n)) matching STLPolicy.forward
    (num_layers=1, h0=None).
    """
    bs, T, S = x0.shape
    H = params["wh0"].shape[1]
    C = params["wproj"].shape[1]
    assert params["whh"].shape == (H, 4 * H)   # gate order (i, f, g, o), b = b_ih+b_hh

    mu, sigma = stats                                      # numpy [1, 1, S+C]
    mu_x = jnp.asarray(mu[0, :, :S], jnp.float32)          # [1, S]
    sig_x = jnp.asarray(sigma[0, :, :S], jnp.float32)
    mu_u = jnp.asarray(mu[0, :, S:], jnp.float32)          # [1, C]
    sig_u = jnp.asarray(sigma[0, :, S:], jnp.float32)

    # standardized control limits (buffers of the torch module, static here)
    a_lim = (np.array([dyn.a_min, dyn.a_max], np.float64) - mu[0, 0, S]) / sigma[0, 0, S]
    d_lim = (np.array([dyn.delta_min, dyn.delta_max], np.float64) - mu[0, 0, S + 1]) / sigma[0, 0, S + 1]
    half_vec = jnp.array([(a_lim[1] - a_lim[0]) / 2.0,
                          (d_lim[1] - d_lim[0]) / 2.0], jnp.float32)     # [2]
    mean_vec = jnp.array([a_lim.mean(), d_lim.mean()], jnp.float32)      # [2]

    # ---- non-recurrent precompute (lane-dense, fused by XLA) ----------------
    x_tm = jnp.transpose(x0, (1, 0, 2))                    # time-major [T, bs, S]
    xg = jnp.matmul(x_tm, params["wih"]) + params["b"]     # [T, bs, 4H] fused slab

    x_first = x0[:, 0, :]                                  # [bs, S]
    h0 = x_first @ params["wh0"] + params["bh0"]           # [bs, H]
    c0 = x_first @ params["wc0"] + params["bc0"]           # [bs, H]

    # ---- pad batch to a full 8-sublane multiple (padded rows are zeros) ------
    bs_p = int(-(-bs // 8) * 8)
    pad = bs_p - bs
    if pad:
        xg = jnp.pad(xg, ((0, 0), (0, pad), (0, 0)))
        h0 = jnp.pad(h0, ((0, pad), (0, 0)))
        c0 = jnp.pad(c0, ((0, pad), (0, 0)))

    # ---- single-invocation Pallas kernel for the serial LSTM scan -----------
    kernel = functools.partial(_lstm_recurrence_kernel, T=T, H=H)

    grid_spec = pltpu.PrefetchScalarGridSpec(
        num_scalar_prefetch=0,
        grid=(1,),
        in_specs=[
            pl.BlockSpec((T, bs_p, 4 * H), lambda i: (0, 0, 0)),   # fused xg slab
            pl.BlockSpec((H, 4 * H), lambda i: (0, 0)),            # W_hh [32, 128]
            pl.BlockSpec((bs_p, H), lambda i: (0, 0)),             # h0
            pl.BlockSpec((bs_p, H), lambda i: (0, 0)),             # c0
        ],
        out_specs=[
            pl.BlockSpec((T, bs_p, H), lambda i: (0, 0, 0)),       # o (time-major)
            pl.BlockSpec((bs_p, H), lambda i: (0, 0)),             # h_N
            pl.BlockSpec((bs_p, H), lambda i: (0, 0)),             # c_N
        ],
    )

    o_tm, hN, cN = pl.pallas_call(
        kernel,
        out_shape=(
            jax.ShapeDtypeStruct((T, bs_p, H), jnp.float32),
            jax.ShapeDtypeStruct((bs_p, H), jnp.float32),
            jax.ShapeDtypeStruct((bs_p, H), jnp.float32),
        ),
        grid_spec=grid_spec,
        compiler_params=pltpu.CompilerParams(
            dimension_semantics=("arbitrary",)),
    )(xg, params["whh"], h0, c0)

    o = jnp.transpose(o_tm[:, :bs, :], (1, 0, 2))          # [bs, T, H]
    hN = hN[:bs]
    cN = cN[:bs]

    # ---- non-recurrent tail in plain JAX (proj + rescale + dynamics) --------
    u_raw = jnp.tanh(o @ params["wproj"] + params["bproj"])          # [bs, T, C]
    u = half_vec * u_raw + mean_vec                                  # broadcast [2]

    x_un = x0 * sig_x + mu_x
    u_un = u * sig_u + mu_u
    px, py, psi, v = x_un[..., 0:1], x_un[..., 1:2], x_un[..., 2:3], x_un[..., 3:4]
    acc, dlt = u_un[..., 0:1], u_un[..., 1:2]
    xn_un = jnp.concatenate(
        [px + dyn.dt * v * jnp.cos(psi),
         py + dyn.dt * v * jnp.sin(psi),
         psi + dyn.dt * v / dyn.wheelbase * jnp.tan(dlt),
         v + dyn.dt * acc], axis=-1)
    x_next = (xn_un - mu_x) / sig_x

    return o, u, x_next, (hN[None], cN[None])


# ----------------------------------------------------------------------------
# Pure-JAX reference (for verification only).
# ----------------------------------------------------------------------------
def reference_forward(x0, params, stats, dyn=KinematicBicycle):
    bs, T, S = x0.shape
    H = params["wh0"].shape[1]
    mu, sigma = stats
    mu_x = jnp.asarray(mu[0, :, :S], jnp.float32)
    sig_x = jnp.asarray(sigma[0, :, :S], jnp.float32)
    mu_u = jnp.asarray(mu[0, :, S:], jnp.float32)
    sig_u = jnp.asarray(sigma[0, :, S:], jnp.float32)
    a_lim = (np.array([dyn.a_min, dyn.a_max]) - mu[0, 0, 4]) / sigma[0, 0, 4]
    d_lim = (np.array([dyn.delta_min, dyn.delta_max]) - mu[0, 0, 5]) / sigma[0, 0, 5]
    a_half, a_mean = (a_lim[1] - a_lim[0]) / 2.0, a_lim.mean()
    d_half, d_mean = (d_lim[1] - d_lim[0]) / 2.0, d_lim.mean()

    x_first = x0[:, 0, :]
    h = x_first @ params["wh0"] + params["bh0"]
    c = x_first @ params["wc0"] + params["bc0"]

    def step(carry, x_t):
        h, c = carry
        gates = x_t @ params["wih"] + h @ params["whh"] + params["b"]
        i_g = jax.nn.sigmoid(gates[:, :H])
        f_g = jax.nn.sigmoid(gates[:, H:2 * H])
        g_g = jnp.tanh(gates[:, 2 * H:3 * H])
        o_g = jax.nn.sigmoid(gates[:, 3 * H:])
        c = f_g * c + i_g * g_g
        h = o_g * jnp.tanh(c)
        return (h, c), h

    (hN, cN), o_tm = jax.lax.scan(step, (h, c), jnp.transpose(x0, (1, 0, 2)))
    o = jnp.transpose(o_tm, (1, 0, 2))
    u_raw = jnp.tanh(o @ params["wproj"] + params["bproj"])
    a = a_half * u_raw[..., :1] + a_mean
    delta = d_half * u_raw[..., 1:] + d_mean
    u = jnp.concatenate([a, delta], -1)
    x_un = x0 * sig_x + mu_x
    u_un = u * sig_u + mu_u
    px, py, psi, v = x_un[..., 0:1], x_un[..., 1:2], x_un[..., 2:3], x_un[..., 3:4]
    acc, dlt = u_un[..., 0:1], u_un[..., 1:2]
    xn_un = jnp.concatenate(
        [px + dyn.dt * v * jnp.cos(psi),
         py + dyn.dt * v * jnp.sin(psi),
         psi + dyn.dt * v / dyn.wheelbase * jnp.tan(dlt),
         v + dyn.dt * acc], -1)
    xn = (xn_un - mu_x) / sig_x
    return o, u, xn, (hN[None], cN[None])


# ----------------------------------------------------------------------------
# Deterministic parameter init.
# ----------------------------------------------------------------------------
def init_params(key, S, H, C):
    ks = jax.random.split(key, 9)
    kl = 1.0 / np.sqrt(H)
    ki = 1.0 / np.sqrt(S)

    def u(k, shape, s):
        return jax.random.uniform(k, shape, jnp.float32, -s, s)

    return dict(
        wih=u(ks[0], (S, 4 * H), kl),       # LSTM W_ih^T (gate order i,f,g,o)
        whh=u(ks[1], (H, 4 * H), kl),       # LSTM W_hh^T (kept lane-dense [H, 4H])
        b=u(ks[2], (1, 4 * H), kl),         # b_ih + b_hh (combined)
        wproj=u(ks[3], (H, C), kl),         # proj Linear W^T
        bproj=u(ks[4], (1, C), kl),
        wh0=u(ks[5], (S, H), ki),           # initialize_rnn_h
        bh0=u(ks[6], (1, H), ki),
        wc0=u(ks[7], (S, H), ki),           # initialize_rnn_c
        bc0=u(ks[8], (1, H), ki),
    )


if __name__ == "__main__":
    bs, T, S, H, C = 2, 8, 4, 32, 2

    key = jax.random.PRNGKey(0)
    kx, kp = jax.random.split(key)
    params = init_params(kp, S, H, C)

    # deterministic stats [mu, sigma] of shape [1, 1, state_dim + ctrl_dim]
    mu = np.array([[[0.5, -0.2, 0.1, 2.0, 0.0, 0.0]]], np.float32)
    sigma = np.array([[[3.0, 3.0, 1.0, 2.0, 2.0, 0.3]]], np.float32)
    stats = (mu, sigma)

    x0 = jax.random.normal(kx, (bs, T, S), jnp.float32)   # standardized states

    o, u, x_next, (hN, cN) = stl_policy_forward(x0, params, stats)
    jax.block_until_ready((o, u, x_next, hN, cN))

    o_r, u_r, xn_r, (hN_r, cN_r) = reference_forward(x0, params, stats)
    np.testing.assert_allclose(np.asarray(o), np.asarray(o_r), atol=1e-3, rtol=1e-3)
    np.testing.assert_allclose(np.asarray(u), np.asarray(u_r), atol=1e-3, rtol=1e-3)
    np.testing.assert_allclose(np.asarray(x_next), np.asarray(xn_r), atol=1e-3, rtol=1e-3)
    np.testing.assert_allclose(np.asarray(hN), np.asarray(hN_r), atol=1e-3, rtol=1e-3)
    np.testing.assert_allclose(np.asarray(cN), np.asarray(cN_r), atol=1e-3, rtol=1e-3)

    print("KERNEL_OK")
</pallas_src>

<mosaic_0001>
module attributes {stable_mosaic.version = 11 : i64} {
  func.func @_lstm_recurrence_kernel(%arg0: i32, %arg1: memref<8x8x128xf32, #tpu.memory_space<vmem>>, %arg2: memref<32x128xf32, #tpu.memory_space<vmem>>, %arg3: memref<8x32xf32, #tpu.memory_space<vmem>>, %arg4: memref<8x32xf32, #tpu.memory_space<vmem>>, %arg5: memref<8x8x32xf32, #tpu.memory_space<vmem>>, %arg6: memref<8x32xf32, #tpu.memory_space<vmem>>, %arg7: memref<8x32xf32, #tpu.memory_space<vmem>>) attributes {dimension_semantics = [#tpu.dimension_semantics<arbitrary>], iteration_bounds = array<i64: 1>, scalar_prefetch = 0 : i64, scratch_operands = 0 : i64, tpu.core_type = #tpu.core_type<tc>, window_params = [{pipeline_mode = #tpu.pipeline_mode<synchronous>, transform_indices = @transform_0, window_bounds = array<i64: 8, 8, 128>}, {pipeline_mode = #tpu.pipeline_mode<synchronous>, transform_indices = @transform_1, window_bounds = array<i64: 32, 128>}, {pipeline_mode = #tpu.pipeline_mode<synchronous>, transform_indices = @transform_2, window_bounds = array<i64: 8, 32>}, {pipeline_mode = #tpu.pipeline_mode<synchronous>, transform_indices = @transform_3, window_bounds = array<i64: 8, 32>}, {pipeline_mode = #tpu.pipeline_mode<synchronous>, transform_indices = @transform_4, window_bounds = array<i64: 8, 8, 32>}, {pipeline_mode = #tpu.pipeline_mode<synchronous>, transform_indices = @transform_5, window_bounds = array<i64: 8, 32>}, {pipeline_mode = #tpu.pipeline_mode<synchronous>, transform_indices = @transform_6, window_bounds = array<i64: 8, 32>}]} {
    %c0 = arith.constant 0 : index
    %c0_0 = arith.constant 0 : index
    %0 = vector.load %arg2[%c0, %c0_0] : memref<32x128xf32, #tpu.memory_space<vmem>>, vector<32x128xf32>
    %1 = tpu.iota {dimensions = array<i32: 1>} : vector<8x128xi32>
    %c64_i32 = arith.constant 64 : i32
    %2 = vector.broadcast %c64_i32 : i32 to vector<8x128xi32>
    %3 = arith.cmpi sge, %1, %2 : vector<8x128xi32>
    %c96_i32 = arith.constant 96 : i32
    %4 = vector.broadcast %c96_i32 : i32 to vector<8x128xi32>
    %5 = arith.cmpi slt, %1, %4 : vector<8x128xi32>
    %6 = arith.andi %3, %5 : vector<8x128xi1>
    %cst = arith.constant 1.000000e+00 : f32
    %cst_1 = arith.constant 5.000000e-01 : f32
    %7 = vector.broadcast %cst : f32 to vector<8x128xf32>
    %8 = vector.broadcast %cst_1 : f32 to vector<8x128xf32>
    %9 = arith.select %6, %7, %8 : vector<8x128xi1>, vector<8x128xf32>
    %cst_2 = arith.constant 0.000000e+00 : f32
    %cst_3 = arith.constant 5.000000e-01 : f32
    %10 = vector.broadcast %cst_2 : f32 to vector<8x128xf32>
    %11 = vector.broadcast %cst_3 : f32 to vector<8x128xf32>
    %12 = arith.select %6, %10, %11 : vector<8x128xi1>, vector<8x128xf32>
    %c0_4 = arith.constant 0 : index
    %c0_5 = arith.constant 0 : index
    %13 = vector.load %arg3[%c0_4, %c0_5] : memref<8x32xf32, #tpu.memory_space<vmem>>, vector<8x32xf32>
    %c0_6 = arith.constant 0 : index
    %c0_7 = arith.constant 0 : index
    %14 = vector.load %arg4[%c0_6, %c0_7] : memref<8x32xf32, #tpu.memory_space<vmem>>, vector<8x32xf32>
    %c0_i32 = arith.constant 0 : i32
    %15 = arith.index_cast %c0_i32 : i32 to index
    %c0_8 = arith.constant 0 : index
    %c0_9 = arith.constant 0 : index
    %16 = vector.load %arg1[%15, %c0_8, %c0_9] : memref<8x8x128xf32, #tpu.memory_space<vmem>>, vector<1x8x128xf32>
    %17 = vector.shape_cast %16 : vector<1x8x128xf32> to vector<8x128xf32>
    %cst_10 = arith.constant dense<0.000000e+00> : vector<8x128xf32>
    %18 = tpu.matmul %13, %0, %cst_10 {dimension_numbers = #tpu.dot_dimension_numbers<[1], [0], [0], [1], [0, 0, 1, 1], [], []>, precision = #tpu.contract_precision<fp32>} : vector<8x32xf32>, vector<32x128xf32>, vector<8x128xf32> -> vector<8x128xf32>
    %19 = arith.addf %17, %18 : vector<8x128xf32>
    %20 = arith.mulf %9, %19 : vector<8x128xf32>
    %21 = math.tanh %20 : vector<8x128xf32>
    %22 = arith.mulf %9, %21 : vector<8x128xf32>
    %23 = arith.addf %22, %12 : vector<8x128xf32>
    %24 = vector.extract_strided_slice %23 {offsets = [0, 0], sizes = [8, 32], strides = [1, 1]} : vector<8x128xf32> to vector<8x32xf32>
    %25 = vector.extract_strided_slice %23 {offsets = [0, 32], sizes = [8, 32], strides = [1, 1]} : vector<8x128xf32> to vector<8x32xf32>
    %26 = vector.extract_strided_slice %23 {offsets = [0, 64], sizes = [8, 32], strides = [1, 1]} : vector<8x128xf32> to vector<8x32xf32>
    %27 = vector.extract_strided_slice %23 {offsets = [0, 96], sizes = [8, 32], strides = [1, 1]} : vector<8x128xf32> to vector<8x32xf32>
    %28 = arith.mulf %25, %14 : vector<8x32xf32>
    %29 = arith.mulf %24, %26 : vector<8x32xf32>
    %30 = arith.addf %28, %29 : vector<8x32xf32>
    %31 = math.tanh %30 : vector<8x32xf32>
    %32 = arith.mulf %27, %31 : vector<8x32xf32>
    %33 = arith.index_cast %c0_i32 : i32 to index
    %c0_11 = arith.constant 0 : index
    %c0_12 = arith.constant 0 : index
    %34 = vector.load %arg5[%33, %c0_11, %c0_12] : memref<8x8x32xf32, #tpu.memory_space<vmem>>, vector<1x8x32xf32>
    %35 = vector.shape_cast %34 : vector<1x8x32xf32> to vector<8x32xf32>
    %36 = vector.shape_cast %32 : vector<8x32xf32> to vector<1x8x32xf32>
    tpu.vector_store %arg5[%33, %c0_11, %c0_12], %36 {strides = array<i32>} : memref<8x8x32xf32, #tpu.memory_space<vmem>>, vector<1x8x32xf32>,
    %c1_i32 = arith.constant 1 : i32
    %37 = arith.index_cast %c1_i32 : i32 to index
    %c0_13 = arith.constant 0 : index
    %c0_14 = arith.constant 0 : index
    %38 = vector.load %arg1[%37, %c0_13, %c0_14] : memref<8x8x128xf32, #tpu.memory_space<vmem>>, vector<1x8x128xf32>
    %39 = vector.shape_cast %38 : vector<1x8x128xf32> to vector<8x128xf32>
    %cst_15 = arith.constant dense<0.000000e+00> : vector<8x128xf32>
    %40 = tpu.matmul %32, %0, %cst_15 {dimension_numbers = #tpu.dot_dimension_numbers<[1], [0], [0], [1], [0, 0, 1, 1], [], []>, precision = #tpu.contract_precision<fp32>} : vector<8x32xf32>, vector<32x128xf32>, vector<8x128xf32> -> vector<8x128xf32>
    %41 = arith.addf %39, %40 : vector<8x128xf32>
    %42 = arith.mulf %9, %41 : vector<8x128xf32>
    %43 = math.tanh %42 : vector<8x128xf32>
    %44 = arith.mulf %9, %43 : vector<8x128xf32>
    %45 = arith.addf %44, %12 : vector<8x128xf32>
    %46 = vector.extract_strided_slice %45 {offsets = [0, 0], sizes = [8, 32], strides = [1, 1]} : vector<8x128xf32> to vector<8x32xf32>
    %47 = vector.extract_strided_slice %45 {offsets = [0, 32], sizes = [8, 32], strides = [1, 1]} : vector<8x128xf32> to vector<8x32xf32>
    %48 = vector.extract_strided_slice %45 {offsets = [0, 64], sizes = [8, 32], strides = [1, 1]} : vector<8x128xf32> to vector<8x32xf32>
    %49 = vector.extract_strided_slice %45 {offsets = [0, 96], sizes = [8, 32], strides = [1, 1]} : vector<8x128xf32> to vector<8x32xf32>
    %50 = arith.mulf %47, %30 : vector<8x32xf32>
    %51 = arith.mulf %46, %48 : vector<8x32xf32>
    %52 = arith.addf %50, %51 : vector<8x32xf32>
    %53 = math.tanh %52 : vector<8x32xf32>
    %54 = arith.mulf %49, %53 : vector<8x32xf32>
    %55 = arith.index_cast %c1_i32 : i32 to index
    %c0_16 = arith.constant 0 : index
    %c0_17 = arith.constant 0 : index
    %56 = vector.load %arg5[%55, %c0_16, %c0_17] : memref<8x8x32xf32, #tpu.memory_space<vmem>>, vector<1x8x32xf32>
    %57 = vector.shape_cast %56 : vector<1x8x32xf32> to vector<8x32xf32>
    %58 = vector.shape_cast %54 : vector<8x32xf32> to vector<1x8x32xf32>
    tpu.vector_store %arg5[%55, %c0_16, %c0_17], %58 {strides = array<i32>} : memref<8x8x32xf32, #tpu.memory_space<vmem>>, vector<1x8x32xf32>,
    %c2_i32 = arith.constant 2 : i32
    %59 = arith.index_cast %c2_i32 : i32 to index
    %c0_18 = arith.constant 0 : index
    %c0_19 = arith.constant 0 : index
    %60 = vector.load %arg1[%59, %c0_18, %c0_19] : memref<8x8x128xf32, #tpu.memory_space<vmem>>, vector<1x8x128xf32>
    %61 = vector.shape_cast %60 : vector<1x8x128xf32> to vector<8x128xf32>
    %cst_20 = arith.constant dense<0.000000e+00> : vector<8x128xf32>
    %62 = tpu.matmul %54, %0, %cst_20 {dimension_numbers = #tpu.dot_dimension_numbers<[1], [0], [0], [1], [0, 0, 1, 1], [], []>, precision = #tpu.contract_precision<fp32>} : vector<8x32xf32>, vector<32x128xf32>, vector<8x128xf32> -> vector<8x128xf32>
    %63 = arith.addf %61, %62 : vector<8x128xf32>
    %64 = arith.mulf %9, %63 : vector<8x128xf32>
    %65 = math.tanh %64 : vector<8x128xf32>
    %66 = arith.mulf %9, %65 : vector<8x128xf32>
    %67 = arith.addf %66, %12 : vector<8x128xf32>
    %68 = vector.extract_strided_slice %67 {offsets = [0, 0], sizes = [8, 32], strides = [1, 1]} : vector<8x128xf32> to vector<8x32xf32>
    %69 = vector.extract_strided_slice %67 {offsets = [0, 32], sizes = [8, 32], strides = [1, 1]} : vector<8x128xf32> to vector<8x32xf32>
    %70 = vector.extract_strided_slice %67 {offsets = [0, 64], sizes = [8, 32], strides = [1, 1]} : vector<8x128xf32> to vector<8x32xf32>
    %71 = vector.extract_strided_slice %67 {offsets = [0, 96], sizes = [8, 32], strides = [1, 1]} : vector<8x128xf32> to vector<8x32xf32>
    %72 = arith.mulf %69, %52 : vector<8x32xf32>
    %73 = arith.mulf %68, %70 : vector<8x32xf32>
    %74 = arith.addf %72, %73 : vector<8x32xf32>
    %75 = math.tanh %74 : vector<8x32xf32>
    %76 = arith.mulf %71, %75 : vector<8x32xf32>
    %77 = arith.index_cast %c2_i32 : i32 to index
    %c0_21 = arith.constant 0 : index
    %c0_22 = arith.constant 0 : index
    %78 = vector.load %arg5[%77, %c0_21, %c0_22] : memref<8x8x32xf32, #tpu.memory_space<vmem>>, vector<1x8x32xf32>
    %79 = vector.shape_cast %78 : vector<1x8x32xf32> to vector<8x32xf32>
    %80 = vector.shape_cast %76 : vector<8x32xf32> to vector<1x8x32xf32>
    tpu.vector_store %arg5[%77, %c0_21, %c0_22], %80 {strides = array<i32>} : memref<8x8x32xf32, #tpu.memory_space<vmem>>, vector<1x8x32xf32>,
    %c3_i32 = arith.constant 3 : i32
    %81 = arith.index_cast %c3_i32 : i32 to index
    %c0_23 = arith.constant 0 : index
    %c0_24 = arith.constant 0 : index
    %82 = vector.load %arg1[%81, %c0_23, %c0_24] : memref<8x8x128xf32, #tpu.memory_space<vmem>>, vector<1x8x128xf32>
    %83 = vector.shape_cast %82 : vector<1x8x128xf32> to vector<8x128xf32>
    %cst_25 = arith.constant dense<0.000000e+00> : vector<8x128xf32>
    %84 = tpu.matmul %76, %0, %cst_25 {dimension_numbers = #tpu.dot_dimension_numbers<[1], [0], [0], [1], [0, 0, 1, 1], [], []>, precision = #tpu.contract_precision<fp32>} : vector<8x32xf32>, vector<32x128xf32>, vector<8x128xf32> -> vector<8x128xf32>
    %85 = arith.addf %83, %84 : vector<8x128xf32>
    %86 = arith.mulf %9, %85 : vector<8x128xf32>
    %87 = math.tanh %86 : vector<8x128xf32>
    %88 = arith.mulf %9, %87 : vector<8x128xf32>
    %89 = arith.addf %88, %12 : vector<8x128xf32>
    %90 = vector.extract_strided_slice %89 {offsets = [0, 0], sizes = [8, 32], strides = [1, 1]} : vector<8x128xf32> to vector<8x32xf32>
    %91 = vector.extract_strided_slice %89 {offsets = [0, 32], sizes = [8, 32], strides = [1, 1]} : vector<8x128xf32> to vector<8x32xf32>
    %92 = vector.extract_strided_slice %89 {offsets = [0, 64], sizes = [8, 32], strides = [1, 1]} : vector<8x128xf32> to vector<8x32xf32>
    %93 = vector.extract_strided_slice %89 {offsets = [0, 96], sizes = [8, 32], strides = [1, 1]} : vector<8x128xf32> to vector<8x32xf32>
    %94 = arith.mulf %91, %74 : vector<8x32xf32>
    %95 = arith.mulf %90, %92 : vector<8x32xf32>
    %96 = arith.addf %94, %95 : vector<8x32xf32>
    %97 = math.tanh %96 : vector<8x32xf32>
    %98 = arith.mulf %93, %97 : vector<8x32xf32>
    %99 = arith.index_cast %c3_i32 : i32 to index
    %c0_26 = arith.constant 0 : index
    %c0_27 = arith.constant 0 : index
    %100 = vector.load %arg5[%99, %c0_26, %c0_27] : memref<8x8x32xf32, #tpu.memory_space<vmem>>, vector<1x8x32xf32>
    %101 = vector.shape_cast %100 : vector<1x8x32xf32> to vector<8x32xf32>
    %102 = vector.shape_cast %98 : vector<8x32xf32> to vector<1x8x32xf32>
    tpu.vector_store %arg5[%99, %c0_26, %c0_27], %102 {strides = array<i32>} : memref<8x8x32xf32, #tpu.memory_space<vmem>>, vector<1x8x32xf32>,
    %c4_i32 = arith.constant 4 : i32
    %103 = arith.index_cast %c4_i32 : i32 to index
    %c0_28 = arith.constant 0 : index
    %c0_29 = arith.constant 0 : index
    %104 = vector.load %arg1[%103, %c0_28, %c0_29] : memref<8x8x128xf32, #tpu.memory_space<vmem>>, vector<1x8x128xf32>
    %105 = vector.shape_cast %104 : vector<1x8x128xf32> to vector<8x128xf32>
    %cst_30 = arith.constant dense<0.000000e+00> : vector<8x128xf32>
    %106 = tpu.matmul %98, %0, %cst_30 {dimension_numbers = #tpu.dot_dimension_numbers<[1], [0], [0], [1], [0, 0, 1, 1], [], []>, precision = #tpu.contract_precision<fp32>} : vector<8x32xf32>, vector<32x128xf32>, vector<8x128xf32> -> vector<8x128xf32>
    %107 = arith.addf %105, %106 : vector<8x128xf32>
    %108 = arith.mulf %9, %107 : vector<8x128xf32>
    %109 = math.tanh %108 : vector<8x128xf32>
    %110 = arith.mulf %9, %109 : vector<8x128xf32>
    %111 = arith.addf %110, %12 : vector<8x128xf32>
    %112 = vector.extract_strided_slice %111 {offsets = [0, 0], sizes = [8, 32], strides = [1, 1]} : vector<8x128xf32> to vector<8x32xf32>
    %113 = vector.extract_strided_slice %111 {offsets = [0, 32], sizes = [8, 32], strides = [1, 1]} : vector<8x128xf32> to vector<8x32xf32>
    %114 = vector.extract_strided_slice %111 {offsets = [0, 64], sizes = [8, 32], strides = [1, 1]} : vector<8x128xf32> to vector<8x32xf32>
    %115 = vector.extract_strided_slice %111 {offsets = [0, 96], sizes = [8, 32], strides = [1, 1]} : vector<8x128xf32> to vector<8x32xf32>
    %116 = arith.mulf %113, %96 : vector<8x32xf32>
    %117 = arith.mulf %112, %114 : vector<8x32xf32>
    %118 = arith.addf %116, %117 : vector<8x32xf32>
    %119 = math.tanh %118 : vector<8x32xf32>
    %120 = arith.mulf %115, %119 : vector<8x32xf32>
    %121 = arith.index_cast %c4_i32 : i32 to index
    %c0_31 = arith.constant 0 : index
    %c0_32 = arith.constant 0 : index
    %122 = vector.load %arg5[%121, %c0_31, %c0_32] : memref<8x8x32xf32, #tpu.memory_space<vmem>>, vector<1x8x32xf32>
    %123 = vector.shape_cast %122 : vector<1x8x32xf32> to vector<8x32xf32>
    %124 = vector.shape_cast %120 : vector<8x32xf32> to vector<1x8x32xf32>
    tpu.vector_store %arg5[%121, %c0_31, %c0_32], %124 {strides = array<i32>} : memref<8x8x32xf32, #tpu.memory_space<vmem>>, vector<1x8x32xf32>,
    %c5_i32 = arith.constant 5 : i32
    %125 = arith.index_cast %c5_i32 : i32 to index
    %c0_33 = arith.constant 0 : index
    %c0_34 = arith.constant 0 : index
    %126 = vector.load %arg1[%125, %c0_33, %c0_34] : memref<8x8x128xf32, #tpu.memory_space<vmem>>, vector<1x8x128xf32>
    %127 = vector.shape_cast %126 : vector<1x8x128xf32> to vector<8x128xf32>
    %cst_35 = arith.constant dense<0.000000e+00> : vector<8x128xf32>
    %128 = tpu.matmul %120, %0, %cst_35 {dimension_numbers = #tpu.dot_dimension_numbers<[1], [0], [0], [1], [0, 0, 1, 1], [], []>, precision = #tpu.contract_precision<fp32>} : vector<8x32xf32>, vector<32x128xf32>, vector<8x128xf32> -> vector<8x128xf32>
    %129 = arith.addf %127, %128 : vector<8x128xf32>
    %130 = arith.mulf %9, %129 : vector<8x128xf32>
    %131 = math.tanh %130 : vector<8x128xf32>
    %132 = arith.mulf %9, %131 : vector<8x128xf32>
    %133 = arith.addf %132, %12 : vector<8x128xf32>
    %134 = vector.extract_strided_slice %133 {offsets = [0, 0], sizes = [8, 32], strides = [1, 1]} : vector<8x128xf32> to vector<8x32xf32>
    %135 = vector.extract_strided_slice %133 {offsets = [0, 32], sizes = [8, 32], strides = [1, 1]} : vector<8x128xf32> to vector<8x32xf32>
    %136 = vector.extract_strided_slice %133 {offsets = [0, 64], sizes = [8, 32], strides = [1, 1]} : vector<8x128xf32> to vector<8x32xf32>
    %137 = vector.extract_strided_slice %133 {offsets = [0, 96], sizes = [8, 32], strides = [1, 1]} : vector<8x128xf32> to vector<8x32xf32>
    %138 = arith.mulf %135, %118 : vector<8x32xf32>
    %139 = arith.mulf %134, %136 : vector<8x32xf32>
    %140 = arith.addf %138, %139 : vector<8x32xf32>
    %141 = math.tanh %140 : vector<8x32xf32>
    %142 = arith.mulf %137, %141 : vector<8x32xf32>
    %143 = arith.index_cast %c5_i32 : i32 to index
    %c0_36 = arith.constant 0 : index
    %c0_37 = arith.constant 0 : index
    %144 = vector.load %arg5[%143, %c0_36, %c0_37] : memref<8x8x32xf32, #tpu.memory_space<vmem>>, vector<1x8x32xf32>
    %145 = vector.shape_cast %144 : vector<1x8x32xf32> to vector<8x32xf32>
    %146 = vector.shape_cast %142 : vector<8x32xf32> to vector<1x8x32xf32>
    tpu.vector_store %arg5[%143, %c0_36, %c0_37], %146 {strides = array<i32>} : memref<8x8x32xf32, #tpu.memory_space<vmem>>, vector<1x8x32xf32>,
    %c6_i32 = arith.constant 6 : i32
    %147 = arith.index_cast %c6_i32 : i32 to index
    %c0_38 = arith.constant 0 : index
    %c0_39 = arith.constant 0 : index
    %148 = vector.load %arg1[%147, %c0_38, %c0_39] : memref<8x8x128xf32, #tpu.memory_space<vmem>>, vector<1x8x128xf32>
    %149 = vector.shape_cast %148 : vector<1x8x128xf32> to vector<8x128xf32>
    %cst_40 = arith.constant dense<0.000000e+00> : vector<8x128xf32>
    %150 = tpu.matmul %142, %0, %cst_40 {dimension_numbers = #tpu.dot_dimension_numbers<[1], [0], [0], [1], [0, 0, 1, 1], [], []>, precision = #tpu.contract_precision<fp32>} : vector<8x32xf32>, vector<32x128xf32>, vector<8x128xf32> -> vector<8x128xf32>
    %151 = arith.addf %149, %150 : vector<8x128xf32>
    %152 = arith.mulf %9, %151 : vector<8x128xf32>
    %153 = math.tanh %152 : vector<8x128xf32>
    %154 = arith.mulf %9, %153 : vector<8x128xf32>
    %155 = arith.addf %154, %12 : vector<8x128xf32>
    %156 = vector.extract_strided_slice %155 {offsets = [0, 0], sizes = [8, 32], strides = [1, 1]} : vector<8x128xf32> to vector<8x32xf32>
    %157 = vector.extract_strided_slice %155 {offsets = [0, 32], sizes = [8, 32], strides = [1, 1]} : vector<8x128xf32> to vector<8x32xf32>
    %158 = vector.extract_strided_slice %155 {offsets = [0, 64], sizes = [8, 32], strides = [1, 1]} : vector<8x128xf32> to vector<8x32xf32>
    %159 = vector.extract_strided_slice %155 {offsets = [0, 96], sizes = [8, 32], strides = [1, 1]} : vector<8x128xf32> to vector<8x32xf32>
    %160 = arith.mulf %157, %140 : vector<8x32xf32>
    %161 = arith.mulf %156, %158 : vector<8x32xf32>
    %162 = arith.addf %160, %161 : vector<8x32xf32>
    %163 = math.tanh %162 : vector<8x32xf32>
    %164 = arith.mulf %159, %163 : vector<8x32xf32>
    %165 = arith.index_cast %c6_i32 : i32 to index
    %c0_41 = arith.constant 0 : index
    %c0_42 = arith.constant 0 : index
    %166 = vector.load %arg5[%165, %c0_41, %c0_42] : memref<8x8x32xf32, #tpu.memory_space<vmem>>, vector<1x8x32xf32>
    %167 = vector.shape_cast %166 : vector<1x8x32xf32> to vector<8x32xf32>
    %168 = vector.shape_cast %164 : vector<8x32xf32> to vector<1x8x32xf32>
    tpu.vector_store %arg5[%165, %c0_41, %c0_42], %168 {strides = array<i32>} : memref<8x8x32xf32, #tpu.memory_space<vmem>>, vector<1x8x32xf32>,
    %c7_i32 = arith.constant 7 : i32
    %169 = arith.index_cast %c7_i32 : i32 to index
    %c0_43 = arith.constant 0 : index
    %c0_44 = arith.constant 0 : index
    %170 = vector.load %arg1[%169, %c0_43, %c0_44] : memref<8x8x128xf32, #tpu.memory_space<vmem>>, vector<1x8x128xf32>
    %171 = vector.shape_cast %170 : vector<1x8x128xf32> to vector<8x128xf32>
    %cst_45 = arith.constant dense<0.000000e+00> : vector<8x128xf32>
    %172 = tpu.matmul %164, %0, %cst_45 {dimension_numbers = #tpu.dot_dimension_numbers<[1], [0], [0], [1], [0, 0, 1, 1], [], []>, precision = #tpu.contract_precision<fp32>} : vector<8x32xf32>, vector<32x128xf32>, vector<8x128xf32> -> vector<8x128xf32>
    %173 = arith.addf %171, %172 : vector<8x128xf32>
    %174 = arith.mulf %9, %173 : vector<8x128xf32>
    %175 = math.tanh %174 : vector<8x128xf32>
    %176 = arith.mulf %9, %175 : vector<8x128xf32>
    %177 = arith.addf %176, %12 : vector<8x128xf32>
    %178 = vector.extract_strided_slice %177 {offsets = [0, 0], sizes = [8, 32], strides = [1, 1]} : vector<8x128xf32> to vector<8x32xf32>
    %179 = vector.extract_strided_slice %177 {offsets = [0, 32], sizes = [8, 32], strides = [1, 1]} : vector<8x128xf32> to vector<8x32xf32>
    %180 = vector.extract_strided_slice %177 {offsets = [0, 64], sizes = [8, 32], strides = [1, 1]} : vector<8x128xf32> to vector<8x32xf32>
    %181 = vector.extract_strided_slice %177 {offsets = [0, 96], sizes = [8, 32], strides = [1, 1]} : vector<8x128xf32> to vector<8x32xf32>
    %182 = arith.mulf %179, %162 : vector<8x32xf32>
    %183 = arith.mulf %178, %180 : vector<8x32xf32>
    %184 = arith.addf %182, %183 : vector<8x32xf32>
    %185 = math.tanh %184 : vector<8x32xf32>
    %186 = arith.mulf %181, %185 : vector<8x32xf32>
    %187 = arith.index_cast %c7_i32 : i32 to index
    %c0_46 = arith.constant 0 : index
    %c0_47 = arith.constant 0 : index
    %188 = vector.load %arg5[%187, %c0_46, %c0_47] : memref<8x8x32xf32, #tpu.memory_space<vmem>>, vector<1x8x32xf32>
    %189 = vector.shape_cast %188 : vector<1x8x32xf32> to vector<8x32xf32>
    %190 = vector.shape_cast %186 : vector<8x32xf32> to vector<1x8x32xf32>
    tpu.vector_store %arg5[%187, %c0_46, %c0_47], %190 {strides = array<i32>} : memref<8x8x32xf32, #tpu.memory_space<vmem>>, vector<1x8x32xf32>,
    %c8_i32 = arith.constant 8 : i32
    %c0_48 = arith.constant 0 : index
    %c0_49 = arith.constant 0 : index
    %191 = vector.load %arg6[%c0_48, %c0_49] : memref<8x32xf32, #tpu.memory_space<vmem>>, vector<8x32xf32>
    tpu.vector_store %arg6[%c0_48, %c0_49], %186 {strides = array<i32>} : memref<8x32xf32, #tpu.memory_space<vmem>>, vector<8x32xf32>,
    %c0_50 = arith.constant 0 : index
    %c0_51 = arith.constant 0 : index
    %192 = vector.load %arg7[%c0_50, %c0_51] : memref<8x32xf32, #tpu.memory_space<vmem>>, vector<8x32xf32>
    tpu.vector_store %arg7[%c0_50, %c0_51], %184 {strides = array<i32>} : memref<8x32xf32, #tpu.memory_space<vmem>>, vector<8x32xf32>,
    return
  }
  func.func @transform_0(%arg0: i32) -> (i32, i32, i32) {
    %c0_i32 = arith.constant 0 : i32
    %c0_i32_0 = arith.constant 0 : i32
    %c0_i32_1 = arith.constant 0 : i32
    %c0_i32_2 = arith.constant 0 : i32
    return %c0_i32, %c0_i32_0, %c0_i32_1 : i32, i32, i32
  }
  func.func @transform_1(%arg0: i32) -> (i32, i32) {
    %c0_i32 = arith.constant 0 : i32
    %c0_i32_0 = arith.constant 0 : i32
    %c0_i32_1 = arith.constant 0 : i32
    return %c0_i32, %c0_i32_0 : i32, i32
  }
  func.func @transform_2(%arg0: i32) -> (i32, i32) {
    %c0_i32 = arith.constant 0 : i32
    %c0_i32_0 = arith.constant 0 : i32
    %c0_i32_1 = arith.constant 0 : i32
    return %c0_i32, %c0_i32_0 : i32, i32
  }
  func.func @transform_3(%arg0: i32) -> (i32, i32) {
    %c0_i32 = arith.constant 0 : i32
    %c0_i32_0 = arith.constant 0 : i32
    %c0_i32_1 = arith.constant 0 : i32
    return %c0_i32, %c0_i32_0 : i32, i32
  }
  func.func @transform_4(%arg0: i32) -> (i32, i32, i32) {
    %c0_i32 = arith.constant 0 : i32
    %c0_i32_0 = arith.constant 0 : i32
    %c0_i32_1 = arith.constant 0 : i32
    %c0_i32_2 = arith.constant 0 : i32
    return %c0_i32, %c0_i32_0, %c0_i32_1 : i32, i32, i32
  }
  func.func @transform_5(%arg0: i32) -> (i32, i32) {
    %c0_i32 = arith.constant 0 : i32
    %c0_i32_0 = arith.constant 0 : i32
    %c0_i32_1 = arith.constant 0 : i32
    return %c0_i32, %c0_i32_0 : i32, i32
  }
  func.func @transform_6(%arg0: i32) -> (i32, i32) {
    %c0_i32 = arith.constant 0 : i32
    %c0_i32_0 = arith.constant 0 : i32
    %c0_i32_1 = arith.constant 0 : i32
    return %c0_i32, %c0_i32_0 : i32, i32
  }
}

</mosaic_0001>

<bundles_post_ra>
// kernel: tpu_custom_call.1
= control target key start
LH: loop header
LB: loop body
LE: loop exit
PB: predicated region body
PF: predicated region fallthrough
CT: control target
= control target key end

     0   :  { %12 = vsyncpa [#allocation3], 0  ;;  %s6074_s0 = inlined_call_operand.hbm [shape: f32[8,8,128], index: 0, kind: input, shape index: {}]   ;;  %s6075_s1 = inlined_call_operand.hbm [shape: f32[32,128], index: 1, kind: input, shape index: {}]   ;;  %s6076_s2 = inlined_call_operand.hbm [shape: f32[8,32], index: 2, kind: input, shape index: {}]   ;;  %s6077_s3 = inlined_call_operand.vmem [shape: f32[8,32], index: 3, kind: input, shape index: {}]   ;;  %s6078_s4 = inlined_call_operand.hbm [shape: f32[8,8,32], index: 4, kind: output, shape index: {0}]   ;;  %s6079_s5 = inlined_call_operand.hbm [shape: f32[8,32], index: 5, kind: output, shape index: {1}]   ;;  %s6080_s6 = inlined_call_operand.hbm [shape: f32[8,32], index: 6, kind: output, shape index: {2}]  }
   0x1   :  { %13 = vsyncpa [#allocation6], 0 }
   0x2   :  { %14 = vsyncpa [#allocation4], 0 }
   0x3   :  { %15 = vsyncpa [#allocation10], 0  ;;  %s5508_s21 = smov [#allocation5]   ;;  %s5509_s23 = smov [#allocation2]  }
   0x4   :  { %s33_s22 = sshll.u32 %s5508_s21, 4  ;;  %s21_s24 = sshll.u32 %s5509_s23, 4  ;;  %s34_s22 = int_to_ptr.vmem [resolvable:$true] %s33_s22  ;;  %s5558_s24 = int_to_ptr.vmem [resolvable:$true] %s21_s24 }
   0x5   :  { %s5368_s27 = scalar_lea.hbm %s6075_s1, 512 }
   0x6   :  { %p5369_p0 = scmp.ne.s32.totalorder %s6075_s1, %s5368_s27  ;;  %p5372_p1 = scmp.lt.u32.totalorder %s5368_s27, %s6075_s1 }
   0x8   :  { %p5374_p2 = pnand %p5372_p1, %p5369_p0 }
   0xa   :  { %5377 = shalt.err (!%p5374_p2)
}
   0xb   :  { %s5378_s8 = scalar_lea.vmem %s34_s22, 512  ;;  %p5383_p4 = scmp.lt.s32.totalorder %s34_s22, %s34_s22 }
   0xc   :  { %p5379_p3 = scmp.ne.s32.totalorder %s34_s22, %s5378_s8  ;;  %p5384_p5 = scmp.lt.s32.totalorder %s5378_s8, %s5378_s8 }
   0xe   :  { %p5385_p6 = por %p5384_p5, %p5383_p4 }
  0x10   :  { %p5386_p7 = pnand %p5385_p6, %p5379_p3 }
  0x12   :  { %5389 = shalt.err (!%p5386_p7)
}
  0x13   :  { %s5510_s9 = smov 128   ;;  %s5511_s10 = smov 8  }
  0x14   :  { %39 = dma.hbm_to_vmem [thread:$0]  %s6075_s1, 512, %s34_s22, [#allocation6], %s5510_s9, %s5510_s9, %s5511_s10  }
  0x15   :  { %s5390_s15 = scalar_lea.hbm %s6074_s0, 1024 }
  0x16   :  { %p5391_p8 = scmp.ne.s32.totalorder %s6074_s0, %s5390_s15  ;;  %p5394_p9 = scmp.lt.u32.totalorder %s5390_s15, %s6074_s0 }
  0x18   :  { %p5396_p10 = pnand %p5394_p9, %p5391_p8 }
  0x1a   :  { %5399 = shalt.err (!%p5396_p10)
}
  0x1b   :  { %s5400_s20 = scalar_lea.vmem %s5558_s24, 1024  ;;  %p5405_p12 = scmp.lt.s32.totalorder %s5558_s24, %s5558_s24 }
  0x1c   :  { %p5401_p11 = scmp.ne.s32.totalorder %s5558_s24, %s5400_s20  ;;  %p5406_p13 = scmp.lt.s32.totalorder %s5400_s20, %s5400_s20 }
  0x1e   :  { %p5407_p0 = por %p5406_p13, %p5405_p12 }
  0x20   :  { %p5408_p1 = pnand %p5407_p0, %p5401_p11 }
  0x22   :  { %5411 = shalt.err (!%p5408_p1)
}
  0x23   :  { %27 = dma.hbm_to_vmem [thread:$0]  %s6074_s0, 1024, %s5558_s24, [#allocation3], %s5510_s9, %s5510_s9, %s5511_s10  }
  0x24   :  { %s5512_s22 = smov [#allocation7]   ;;  %s5412_s27 = scalar_lea.hbm %s6076_s2, 128 }
  0x25   :  { %s46_s23 = sshll.u32 %s5512_s22, 4  ;;  %p5413_p2 = scmp.ne.s32.totalorder %s6076_s2, %s5412_s27  ;;  %s47_s23 = int_to_ptr.vmem [resolvable:$true] %s46_s23 }
  0x26   :  { %p5416_p3 = scmp.lt.u32.totalorder %s5412_s27, %s6076_s2 }
  0x28   :  { %p5418_p4 = pnand %p5416_p3, %p5413_p2 }
  0x2a   :  { %5421 = shalt.err (!%p5418_p4)
}
  0x2b   :  { %s5422_s8 = scalar_lea.vmem %s47_s23, 128  ;;  %p5427_p6 = scmp.lt.s32.totalorder %s47_s23, %s47_s23 }
  0x2c   :  { %p5423_p5 = scmp.ne.s32.totalorder %s47_s23, %s5422_s8  ;;  %p5428_p7 = scmp.lt.s32.totalorder %s5422_s8, %s5422_s8 }
  0x2e   :  { %p5429_p8 = por %p5428_p7, %p5427_p6 }
  0x30   :  { %p5430_p9 = pnand %p5429_p8, %p5423_p5 }
  0x32   :  { %5433 = shalt.err (!%p5430_p9)
}
  0x33   :  { %49 = dma.hbm_to_vmem [thread:$0]  %s6076_s2, 128, %s47_s23, [#allocation6]  }
  0x34   :  { %5500 = dma.done.wait [#allocation3], 1024  }
  0x35   :  { %5501 = vsyncadd [#allocation3], 4294966272 }
  0x36   :  { %5502 = dma.done.wait [#allocation6], 640  }
  0x37   :  { %5503 = vsyncadd [#allocation6], 4294966656  ;;  %v5513_v0 = vmov 0.0|0.0   ;;  %vm5514_vm0 = vmmov 0   ;;  %v5515_v1 = vmov 0.0   ;;  %vm75_vm1 = vcmask 261120  }
  0x38   :  { %5033 = vmatprep.subr.bf16.mxu0 %v5513_v0  ;;  %5039 = vmatprep.subr.bf16.mxu1 %v5513_v0  ;;  %v61_v2 = vld [vmem:[#allocation5] sm:$0xff]  ;;  %v62_v3 = vld [vmem:[#allocation5 + $0x8] sm:$0xff]  ;;  %v63_v4 = vld [vmem:[#allocation5 + $0x10] sm:$0xff]  ;;  %v65_v49 = vlaneseq  ;;  %v5516_v61 = vmov 0.5   ;;  %s5517_s2 = smov 64   ;;  %s5518_s13 = smov 32  }
  0x39   :  { %4513 = vmatprep.mubr.msk.f32.mxu0 %vm5514_vm0, %v5515_v1  ;;  %4524 = vmatprep.mubr.msk.f32.mxu1 %vm5514_vm0, %v5515_v1  ;;  %v80_v5 = vand.u32 4294901760, %v61_v2  ;;  %v83_v6 = vand.u32 4294901760, %v62_v3  ;;  %v64_v7 = vld [vmem:[#allocation5 + $0x18] sm:$0xff]  ;;  %v86_v8 = vand.u32 4294901760, %v63_v4  ;;  %v72_v9 = vld [vmem:[#allocation7] sm:$0xff]  ;;  %s5520_s14 = smov [#allocation9]  }
  0x3a   :  { %v89_v10 = vand.u32 4294901760, %v64_v7  ;;  %v77_v11 = vsel %vm75_vm1, %v72_v9, 0  ;;  %v66_v51 = vand.u32 127, %v65_v49  ;;  %v74_v57 = vld [vmem:[#allocation2] sm:$0xff]  ;;  %s4238_s15 = sshll.u32 %s5520_s14, 4  ;;  %s5521_s16 = smov [#allocation8]   ;;  %s4239_s15 = int_to_ptr.vmem [resolvable:$true] %s4238_s15 }
  0x3b   :  { %v5614_v12 = vpack.c.bf16 %v83_v6, %v80_v5  ;;  %v160_v13 = vsub.f32 %v61_v2, %v80_v5  ;;  %v167_v14 = vsub.f32 %v62_v3, %v83_v6  ;;  %v148_v15 = vand.u32 4294901760, %v77_v11  ;;  %s4225_s17 = sshll.u32 %s5521_s16, 4  ;;  %s5522_s18 = smov [#allocation11]   ;;  %s6019_s17 = int_to_ptr.vmem [resolvable:$true] %s4225_s17 }
  0x3c   :  { %v174_v16 = vsub.f32 %v63_v4, %v86_v8  ;;  %v181_v17 = vsub.f32 %v64_v7, %v89_v10  ;;  %v5617_v18 = vpack.c.bf16 %v89_v10, %v86_v8  ;;  %vm67_vm2 = vcmp.ge.s32.totalorder %v66_v51, 64  ;;  %v73_v7 = vld [vmem:[%s6077_s3] sm:$0xff]  ;;  %s5519_s3 = smov 96   ;;  %s4248_s19 = sshll.u32 %s5522_s18, 4  ;;  %s6023_s19 = int_to_ptr.vmem [resolvable:$true] %s4248_s19 }
  0x3d   :  { %5035 = vmatpush3.bf16.msra.mxu0 %v5614_v12  ;;  %v161_v19 = vand.u32 4294901760, %v160_v13  ;;  %v168_v20 = vand.u32 4294901760, %v167_v14  ;;  %v149_v21 = vsub.f32 %v77_v11, %v148_v15  ;;  %v5622_v32 = vpack.c.bf16 %v167_v14, %v160_v13  ;;  %s5434_s20 = scalar_lea.vmem %s4239_s15, 128  ;;  %p5439_p11 = scmp.lt.s32.totalorder %s4239_s15, %s4239_s15 }
  0x3e   :  { %5036 = vmatprep.subr.bf16.mxu0 %v5513_v0  ;;  %v175_v22 = vand.u32 4294901760, %v174_v16  ;;  %v182_v23 = vand.u32 4294901760, %v181_v17  ;;  %v5631_v38 = vpack.c.bf16 %v181_v17, %v174_v16  ;;  %vm68_vm3 = vcmp.lt.s32.totalorder %v66_v51, 96  ;;  %p5435_p10 = scmp.ne.s32.totalorder %s4239_s15, %s5434_s20  ;;  %p5440_p12 = scmp.lt.s32.totalorder %s5434_s20, %s5434_s20 }
  0x3f   :  { %v162_v24 = vsub.f32 %v160_v13, %v161_v19  ;;  %v169_v25 = vsub.f32 %v167_v14, %v168_v20  ;;  %v150_v26 = vand.u32 4294901760, %v149_v21  ;;  %v5639_v39 = vpack.c.bf16 %v168_v20, %v161_v19  ;;  %vm69_vm4 = vmand %vm67_vm2, %vm68_vm3 }
  0x40   :  { %v176_v27 = vsub.f32 %v174_v16, %v175_v22  ;;  %v183_v28 = vsub.f32 %v181_v17, %v182_v23  ;;  %v5645_v40 = vpack.c.bf16 %v182_v23, %v175_v22  ;;  %v5674_v62 = vsel %vm69_vm4, 1.0, %v5516_v61  ;;  %p5441_p13 = por %p5440_p12, %p5439_p11 }
  0x41   :  { %5038 = vmatpush3.bf16.msra.mxu0 %v5617_v18  ;;  %v163_v29 = vand.u32 4294901760, %v162_v24  ;;  %v170_v30 = vand.u32 4294901760, %v169_v25  ;;  %v151_v31 = vsub.f32 %v149_v21, %v150_v26  ;;  %v5677_v4 = vsel %vm69_vm4, 0.0, %v5516_v61 }
  0x42   :  { %5045 = vmatprep.subr.bf16.mxu0 %v5513_v0  ;;  %v177_v33 = vand.u32 4294901760, %v176_v27  ;;  %v184_v34 = vand.u32 4294901760, %v183_v28  ;;  %p5442_p0 = pnand %p5441_p13, %p5435_p10 }
  0x43   :  { %v5624_v35 = vpack.c.bf16 %v170_v30, %v163_v29  ;;  %v152_v36 = vand.u32 4294901760, %v151_v31 }
  0x44   :  { %v5627_v37 = vpack.c.bf16 %v184_v34, %v177_v33 }
  0x45   :  { %5041 = vmatpush3.bf16.msra.mxu1 %v5624_v35  ;;  %4514 = vmatmul.mubr.f32.vlgmr.msra.gmra.mrb[0].mxu0 %v152_v36 }
  0x46   :  { %5047 = vmatpush3.bf16.msra.mxu0 %v5622_v32  ;;  %5042 = vmatprep.subr.bf16.mxu1 %v5513_v0 }
  0x47   :  { %5048 = vmatprep.subr.bf16.mxu0 %v5513_v0  ;;  %4535 = vmatprep.mubr.msk.f32.mxu0 %vm5514_vm0, %v5515_v1 }
  0x49   :  { %5044 = vmatpush3.bf16.msra.mxu1 %v5627_v37 }
  0x4a   :  { %5050 = vmatpush3.bf16.msra.mxu0 %v5631_v38  ;;  %5051 = vmatprep.subr.bf16.mxu1 %v5513_v0 }
  0x4b   :  { %5057 = vmatprep.subr.bf16.mxu0 %v5513_v0 }
  0x4c   :  { %4525 = vmatmul.mubr.f32.vlgmr.msra.gmra.mrb[0].mxu1 %v148_v15 }
  0x4d   :  { %5053 = vmatpush3.bf16.msra.mxu1 %v5614_v12  ;;  %4536 = vmatmul.mubr.f32.vlgmr.msra.gmra.mrb[2].mxu0 %v149_v21 }
  0x4e   :  { %5059 = vmatpush3.bf16.msra.mxu0 %v5639_v39  ;;  %5054 = vmatprep.subr.bf16.mxu1 %v5513_v0 }
  0x4f   :  { %5060 = vmatprep.subr.bf16.mxu0 %v5513_v0  ;;  %4546 = vmatprep.mubr.msk.f32.mxu1 %vm5514_vm0, %v5515_v1 }
  0x50   :  { %4557 = vmatprep.mubr.msk.f32.mxu0 %vm5514_vm0, %v5515_v1 }
  0x51   :  { %5056 = vmatpush3.bf16.msra.mxu1 %v5617_v18 }
  0x52   :  { %5062 = vmatpush3.bf16.msra.mxu0 %v5645_v40  ;;  %5063 = vmatprep.subr.bf16.mxu1 %v5513_v0 }
  0x53   :  { %5069 = vmatprep.subr.bf16.mxu0 %v5513_v0 }
  0x54   :  { %4547 = vmatmul.mubr.f32.vlgmr.msra.gmra.mrb[2].mxu1 %v150_v26 }
  0x55   :  { %5065 = vmatpush3.bf16.msra.mxu1 %v5614_v12  ;;  %4558 = vmatmul.mubr.f32.vlgmr.msra.gmra.mrb[4].mxu0 %v148_v15 }
  0x56   :  { %5066 = vmatprep.subr.bf16.mxu1 %v5513_v0  ;;  %4568 = vmatprep.mubr.msk.f32.mxu1 %vm5514_vm0, %v5515_v1 }
  0x57   :  { %5071 = vmatpush3.bf16.msra.mxu0 %v5614_v12  ;;  %4579 = vmatprep.mubr.msk.f32.mxu0 %vm5514_vm0, %v5515_v1 }
  0x58   :  { %5072 = vmatprep.subr.bf16.mxu0 %v5513_v0 }
  0x59   :  { %5068 = vmatpush3.bf16.msra.mxu1 %v5617_v18 }
  0x5a   :  { %5075 = vmatprep.subr.bf16.mxu1 %v5513_v0 }
  0x5b   :  { %5074 = vmatpush3.bf16.msra.mxu0 %v5617_v18 }
  0x5c   :  { %4569 = vmatmul.mubr.f32.vlgmr.msra.gmra.mrb[4].mxu1 %v148_v15  ;;  %5081 = vmatprep.subr.bf16.mxu0 %v5513_v0 }
  0x5d   :  { %5077 = vmatpush3.bf16.msra.mxu1 %v5624_v35  ;;  %4590 = vmatprep.mubr.msk.f32.mxu1 %vm5514_vm0, %v5515_v1 }
  0x5e   :  { %5078 = vmatprep.subr.bf16.mxu1 %v5513_v0 }
  0x61   :  { %5080 = vmatpush3.bf16.msra.mxu1 %v5627_v37 }
  0x62   :  { %5087 = vmatprep.subr.bf16.mxu1 %v5513_v0 }
 0x118   :  { %v154_v41 = vpop.f32.mrb[0].mxu0 }
 0x119   :  { %v4515_v42 = vpop.f32.mrb[1].mxu0 }
 0x11f   :  { %v245_v43 = vpop.f32.mrb[0].mxu1 }
 0x120   :  { %v246_v44 = vadd.f32 %v245_v43, %v154_v41  ;;  %v4526_v45 = vpop.f32.mrb[1].mxu1  ;;  %v325_v46 = vpop.f32.mrb[2].mxu0 }
 0x121   :  { %v4537_v47 = vpop.f32.mrb[3].mxu0 }
 0x122   :  { %v326_v48 = vadd.f32 %v325_v46, %v246_v44 }
 0x127   :  { %v402_v50 = vpop.f32.mrb[2].mxu1 }
 0x128   :  { %v403_v52 = vadd.f32 %v402_v50, %v326_v48  ;;  %v4548_v53 = vpop.f32.mrb[3].mxu1  ;;  %v485_v54 = vpop.f32.mrb[4].mxu0  ;;  %v596_v48 = vld [vmem:[#allocation2 + $0x8] sm:$0xff] }
 0x129   :  { %v4559_v55 = vpop.f32.mrb[5].mxu0 }
 0x12a   :  { %v486_v56 = vadd.f32 %v485_v54, %v403_v52 }
 0x12f   :  { %v560_v58 = vpop.f32.mrb[4].mxu1 }
 0x130   :  { %v561_v59 = vadd.f32 %v560_v58, %v486_v56  ;;  %v4570_v60 = vpop.f32.mrb[5].mxu1 }
 0x132   :  { %v564_v63 = vadd.f32 %v561_v59, %v74_v57 }
 0x134   :  { %v565_v2 = vmul.f32 %v564_v63, %v5674_v62 }
 0x136   :  { %5336 = vtanh.f32 %v565_v2 }
 0x140   :  { %v5337_v3 = vpop.eup %5336 }
 0x141   :  { %v567_v5 = vmul.f32 %v5337_v3, %v5674_v62 }
 0x143   :  { %v568_v6 = vadd.f32 %v567_v5, %v5677_v4 }
 0x145   :  { %575 = vrot.lane.b32.xlu0 %v568_v6, %s5517_s2 }
 0x149   :  { %570 = vrot.lane.b32.xlu0 %v73_v7, %s5518_s13 }
 0x1b7   :  { %v576_v8 = vpop.permute.xlu0 %575 }
 0x1b8   :  { %v578_v9 = vmul.f32 %v576_v8, %v568_v6 }
 0x1ba   :  { %580 = vrot.lane.b32.xlu1 %v578_v9, %s5518_s13 }
 0x1bb   :  { %v571_v10 = vpop.permute.xlu0 %570 }
 0x1bc   :  { %v573_v11 = vmul.f32 %v571_v10, %v568_v6 }
 0x22c   :  { %v581_v13 = vpop.permute.xlu1 %580 }
 0x22d   :  { %v5687_v14 = vadd.f32 %v581_v13, %v573_v11 }
 0x22f   :  { %5338 = vtanh.f32 %v5687_v14 }
 0x239   :  { %v5339_v15 = vpop.eup %5338 }
 0x23a   :  { %586 = vrot.lane.b32.xlu1 %v5339_v15, %s5517_s2 }
 0x2ac   :  { %v587_v16 = vpop.permute.xlu1 %586 }
 0x2ad   :  { %v589_v17 = vmul.f32 %v587_v16, %v568_v6 }
 0x2af   :  { %591 = vrot.lane.b32.xlu0 %v589_v17, %s5518_s13 }
 0x321   :  { %v592_v19 = vpop.permute.xlu0 %591 }
 0x322   :  { %594 = vst.msk [vmem:[#allocation8] sm:$0xff] %vm75_vm1, %v592_v19  ;;  %v597_v20 = vsel %vm75_vm1, %v592_v19, 0 }
 0x323   :  { %v668_v21 = vand.u32 4294901760, %v597_v20 }
 0x325   :  { %v669_v22 = vsub.f32 %v597_v20, %v668_v21  ;;  %4591 = vmatmul.mubr.f32.vlgmr.msra.gmra.mrb[6].mxu1 %v668_v21 }
 0x326   :  { %5089 = vmatpush3.bf16.msra.mxu1 %v5614_v12  ;;  %4612 = vmatprep.mubr.msk.f32.mxu1 %vm5514_vm0, %v5515_v1 }
 0x327   :  { %v670_v23 = vand.u32 4294901760, %v669_v22  ;;  %5090 = vmatprep.subr.bf16.mxu1 %v5513_v0 }
 0x329   :  { %v671_v24 = vsub.f32 %v669_v22, %v670_v23 }
 0x32a   :  { %5092 = vmatpush3.bf16.msra.mxu1 %v5617_v18 }
 0x32b   :  { %5099 = vmatprep.subr.bf16.mxu1 %v5513_v0  ;;  %v672_v25 = vand.u32 4294901760, %v671_v24 }
 0x32d   :  { %4613 = vmatmul.mubr.f32.vlgmr.msra.gmra.mrb[8].mxu1 %v670_v23  ;;  %4580 = vmatmul.mubr.f32.vlgmr.msra.gmra.mrb[6].mxu0 %v672_v25 }
 0x32e   :  { %5083 = vmatpush3.bf16.msra.mxu0 %v5622_v32  ;;  %5101 = vmatpush3.bf16.msra.mxu1 %v5614_v12 }
 0x32f   :  { %5084 = vmatprep.subr.bf16.mxu0 %v5513_v0  ;;  %5102 = vmatprep.subr.bf16.mxu1 %v5513_v0 }
 0x330   :  { %4601 = vmatprep.mubr.msk.f32.mxu0 %vm5514_vm0, %v5515_v1  ;;  %4634 = vmatprep.mubr.msk.f32.mxu1 %vm5514_vm0, %v5515_v1 }
 0x332   :  { %5086 = vmatpush3.bf16.msra.mxu0 %v5631_v38  ;;  %5104 = vmatpush3.bf16.msra.mxu1 %v5617_v18 }
 0x333   :  { %5093 = vmatprep.subr.bf16.mxu0 %v5513_v0  ;;  %5111 = vmatprep.subr.bf16.mxu1 %v5513_v0 }
 0x335   :  { %4602 = vmatmul.mubr.f32.vlgmr.msra.gmra.mrb[8].mxu0 %v669_v22  ;;  %4635 = vmatmul.mubr.f32.vlgmr.msra.gmra.mrb[10].mxu1 %v668_v21 }
 0x336   :  { %5095 = vmatpush3.bf16.msra.mxu0 %v5639_v39  ;;  %4623 = vmatprep.mubr.msk.f32.mxu0 %vm5514_vm0, %v5515_v1 }
 0x337   :  { %5096 = vmatprep.subr.bf16.mxu0 %v5513_v0  ;;  %5113 = vmatpush3.bf16.msra.mxu1 %v5624_v35 }
 0x338   :  { %5114 = vmatprep.subr.bf16.mxu1 %v5513_v0  ;;  %4656 = vmatprep.mubr.msk.f32.mxu1 %vm5514_vm0, %v5515_v1 }
 0x33a   :  { %5098 = vmatpush3.bf16.msra.mxu0 %v5645_v40 }
 0x33b   :  { %5116 = vmatpush3.bf16.msra.mxu1 %v5627_v37  ;;  %5105 = vmatprep.subr.bf16.mxu0 %v5513_v0 }
 0x33c   :  { %5123 = vmatprep.subr.bf16.mxu1 %v5513_v0 }
 0x33d   :  { %4624 = vmatmul.mubr.f32.vlgmr.msra.gmra.mrb[10].mxu0 %v668_v21 }
 0x33e   :  { %5107 = vmatpush3.bf16.msra.mxu0 %v5614_v12  ;;  %4645 = vmatprep.mubr.msk.f32.mxu0 %vm5514_vm0, %v5515_v1 }
 0x33f   :  { %5108 = vmatprep.subr.bf16.mxu0 %v5513_v0 }
 0x342   :  { %5110 = vmatpush3.bf16.msra.mxu0 %v5617_v18 }
 0x343   :  { %5117 = vmatprep.subr.bf16.mxu0 %v5513_v0 }
 0x3f8   :  { %v765_v26 = vpop.f32.mrb[6].mxu1 }
 0x3f9   :  { %v4592_v27 = vpop.f32.mrb[7].mxu1 }
 0x400   :  { %v922_v28 = vpop.f32.mrb[8].mxu1  ;;  %v674_v29 = vpop.f32.mrb[6].mxu0 }
 0x401   :  { %v766_v30 = vadd.f32 %v765_v26, %v674_v29  ;;  %v4614_v31 = vpop.f32.mrb[9].mxu1  ;;  %v4581_v33 = vpop.f32.mrb[7].mxu0 }
 0x408   :  { %v845_v34 = vpop.f32.mrb[8].mxu0  ;;  %v1080_v36 = vpop.f32.mrb[10].mxu1 }
 0x409   :  { %v846_v41 = vadd.f32 %v845_v34, %v766_v30  ;;  %v4603_v42 = vpop.f32.mrb[9].mxu0  ;;  %v4636_v43 = vpop.f32.mrb[11].mxu1 }
 0x40b   :  { %v923_v44 = vadd.f32 %v922_v28, %v846_v41  ;;  %v1113_v28 = vld [vmem:[#allocation2 + $0x10] sm:$0xff] }
 0x410   :  { %v1005_v45 = vpop.f32.mrb[10].mxu0 }
 0x411   :  { %v1006_v46 = vadd.f32 %v1005_v45, %v923_v44  ;;  %v4625_v47 = vpop.f32.mrb[11].mxu0 }
 0x413   :  { %v1081_v49 = vadd.f32 %v1080_v36, %v1006_v46 }
 0x415   :  { %v1084_v50 = vadd.f32 %v1081_v49, %v596_v48 }
 0x417   :  { %v1085_v51 = vmul.f32 %v1084_v50, %v5674_v62 }
 0x419   :  { %5340 = vtanh.f32 %v1085_v51 }
 0x423   :  { %v5341_v52 = vpop.eup %5340 }
 0x424   :  { %v1087_v53 = vmul.f32 %v5341_v52, %v5674_v62 }
 0x426   :  { %v1088_v54 = vadd.f32 %v1087_v53, %v5677_v4 }
 0x428   :  { %1091 = vrot.lane.b32.xlu1 %v1088_v54, %s5517_s2  ;;  %v1089_v57 = vmul.f32 %v1088_v54, %v5687_v14 }
 0x49a   :  { %v1092_v55 = vpop.permute.xlu1 %1091 }
 0x49b   :  { %v1094_v56 = vmul.f32 %v1092_v55, %v1088_v54 }
 0x49d   :  { %1096 = vrot.lane.b32.xlu0 %v1094_v56, %s5518_s13 }
 0x50f   :  { %v1097_v58 = vpop.permute.xlu0 %1096 }
 0x510   :  { %v5736_v59 = vadd.f32 %v1097_v58, %v1089_v57 }
 0x512   :  { %5342 = vtanh.f32 %v5736_v59 }
 0x51c   :  { %v5343_v60 = vpop.eup %5342 }
 0x51d   :  { %1102 = vrot.lane.b32.xlu1 %v5343_v60, %s5517_s2 }
 0x58f   :  { %v1103_v61 = vpop.permute.xlu1 %1102 }
 0x590   :  { %v1105_v63 = vmul.f32 %v1103_v61, %v1088_v54 }
 0x592   :  { %1107 = vrot.lane.b32.xlu0 %v1105_v63, %s5518_s13 }
 0x604   :  { %v1108_v2 = vpop.permute.xlu0 %1107 }
 0x605   :  { %1111 = vst.msk [vmem:[#allocation8 + $0x8] sm:$0xff] %vm75_vm1, %v1108_v2  ;;  %v1114_v3 = vsel %vm75_vm1, %v1108_v2, 0 }
 0x606   :  { %v1185_v5 = vand.u32 4294901760, %v1114_v3 }
 0x608   :  { %v1186_v6 = vsub.f32 %v1114_v3, %v1185_v5  ;;  %4657 = vmatmul.mubr.f32.vlgmr.msra.gmra.mrb[12].mxu1 %v1185_v5 }
 0x609   :  { %5125 = vmatpush3.bf16.msra.mxu1 %v5614_v12  ;;  %4678 = vmatprep.mubr.msk.f32.mxu1 %vm5514_vm0, %v5515_v1 }
 0x60a   :  { %v1187_v7 = vand.u32 4294901760, %v1186_v6  ;;  %5126 = vmatprep.subr.bf16.mxu1 %v5513_v0 }
 0x60c   :  { %v1188_v8 = vsub.f32 %v1186_v6, %v1187_v7 }
 0x60d   :  { %5128 = vmatpush3.bf16.msra.mxu1 %v5617_v18 }
 0x60e   :  { %5135 = vmatprep.subr.bf16.mxu1 %v5513_v0  ;;  %v1189_v9 = vand.u32 4294901760, %v1188_v8 }
 0x610   :  { %4679 = vmatmul.mubr.f32.vlgmr.msra.gmra.mrb[14].mxu1 %v1187_v7  ;;  %4646 = vmatmul.mubr.f32.vlgmr.msra.gmra.mrb[12].mxu0 %v1189_v9 }
 0x611   :  { %5119 = vmatpush3.bf16.msra.mxu0 %v5622_v32  ;;  %5137 = vmatpush3.bf16.msra.mxu1 %v5614_v12 }
 0x612   :  { %5120 = vmatprep.subr.bf16.mxu0 %v5513_v0  ;;  %5138 = vmatprep.subr.bf16.mxu1 %v5513_v0 }
 0x613   :  { %4667 = vmatprep.mubr.msk.f32.mxu0 %vm5514_vm0, %v5515_v1  ;;  %4700 = vmatprep.mubr.msk.f32.mxu1 %vm5514_vm0, %v5515_v1 }
 0x615   :  { %5122 = vmatpush3.bf16.msra.mxu0 %v5631_v38  ;;  %5140 = vmatpush3.bf16.msra.mxu1 %v5617_v18 }
 0x616   :  { %5129 = vmatprep.subr.bf16.mxu0 %v5513_v0  ;;  %5147 = vmatprep.subr.bf16.mxu1 %v5513_v0 }
 0x618   :  { %4668 = vmatmul.mubr.f32.vlgmr.msra.gmra.mrb[14].mxu0 %v1186_v6  ;;  %4701 = vmatmul.mubr.f32.vlgmr.msra.gmra.mrb[16].mxu1 %v1185_v5 }
 0x619   :  { %5131 = vmatpush3.bf16.msra.mxu0 %v5639_v39  ;;  %4689 = vmatprep.mubr.msk.f32.mxu0 %vm5514_vm0, %v5515_v1 }
 0x61a   :  { %5132 = vmatprep.subr.bf16.mxu0 %v5513_v0  ;;  %5149 = vmatpush3.bf16.msra.mxu1 %v5624_v35 }
 0x61b   :  { %5150 = vmatprep.subr.bf16.mxu1 %v5513_v0  ;;  %4722 = vmatprep.mubr.msk.f32.mxu1 %vm5514_vm0, %v5515_v1 }
 0x61d   :  { %5134 = vmatpush3.bf16.msra.mxu0 %v5645_v40 }
 0x61e   :  { %5152 = vmatpush3.bf16.msra.mxu1 %v5627_v37  ;;  %5141 = vmatprep.subr.bf16.mxu0 %v5513_v0 }
 0x61f   :  { %5159 = vmatprep.subr.bf16.mxu1 %v5513_v0 }
 0x620   :  { %4690 = vmatmul.mubr.f32.vlgmr.msra.gmra.mrb[16].mxu0 %v1185_v5 }
 0x621   :  { %5143 = vmatpush3.bf16.msra.mxu0 %v5614_v12  ;;  %4711 = vmatprep.mubr.msk.f32.mxu0 %vm5514_vm0, %v5515_v1 }
 0x622   :  { %5144 = vmatprep.subr.bf16.mxu0 %v5513_v0 }
 0x625   :  { %5146 = vmatpush3.bf16.msra.mxu0 %v5617_v18 }
 0x626   :  { %5153 = vmatprep.subr.bf16.mxu0 %v5513_v0 }
 0x6db   :  { %v1282_v10 = vpop.f32.mrb[12].mxu1 }
 0x6dc   :  { %v4658_v11 = vpop.f32.mrb[13].mxu1 }
 0x6e3   :  { %v1439_v13 = vpop.f32.mrb[14].mxu1  ;;  %v1191_v14 = vpop.f32.mrb[12].mxu0 }
 0x6e4   :  { %v1283_v15 = vadd.f32 %v1282_v10, %v1191_v14  ;;  %v4680_v16 = vpop.f32.mrb[15].mxu1  ;;  %v4647_v17 = vpop.f32.mrb[13].mxu0 }
 0x6eb   :  { %v1362_v19 = vpop.f32.mrb[14].mxu0  ;;  %v1597_v20 = vpop.f32.mrb[16].mxu1 }
 0x6ec   :  { %v1363_v21 = vadd.f32 %v1362_v19, %v1283_v15  ;;  %v4669_v22 = vpop.f32.mrb[15].mxu0  ;;  %v4702_v23 = vpop.f32.mrb[17].mxu1 }
 0x6ee   :  { %v1440_v24 = vadd.f32 %v1439_v13, %v1363_v21  ;;  %v1630_v13 = vld [vmem:[#allocation2 + $0x18] sm:$0xff] }
 0x6f3   :  { %v1522_v25 = vpop.f32.mrb[16].mxu0 }
 0x6f4   :  { %v1523_v26 = vadd.f32 %v1522_v25, %v1440_v24  ;;  %v4691_v27 = vpop.f32.mrb[17].mxu0 }
 0x6f6   :  { %v1598_v29 = vadd.f32 %v1597_v20, %v1523_v26 }
 0x6f8   :  { %v1601_v30 = vadd.f32 %v1598_v29, %v1113_v28 }
 0x6fa   :  { %v1602_v31 = vmul.f32 %v1601_v30, %v5674_v62 }
 0x6fc   :  { %5344 = vtanh.f32 %v1602_v31 }
 0x706   :  { %v5345_v33 = vpop.eup %5344 }
 0x707   :  { %v1604_v34 = vmul.f32 %v5345_v33, %v5674_v62 }
 0x709   :  { %v1605_v36 = vadd.f32 %v1604_v34, %v5677_v4 }
 0x70b   :  { %1608 = vrot.lane.b32.xlu1 %v1605_v36, %s5517_s2  ;;  %v1606_v43 = vmul.f32 %v1605_v36, %v5736_v59 }
 0x77d   :  { %v1609_v41 = vpop.permute.xlu1 %1608 }
 0x77e   :  { %v1611_v42 = vmul.f32 %v1609_v41, %v1605_v36 }
 0x780   :  { %1613 = vrot.lane.b32.xlu0 %v1611_v42, %s5518_s13 }
 0x7f2   :  { %v1614_v44 = vpop.permute.xlu0 %1613 }
 0x7f3   :  { %v5785_v45 = vadd.f32 %v1614_v44, %v1606_v43 }
 0x7f5   :  { %5346 = vtanh.f32 %v5785_v45 }
 0x7ff   :  { %v5347_v46 = vpop.eup %5346 }
 0x800   :  { %1619 = vrot.lane.b32.xlu1 %v5347_v46, %s5517_s2 }
 0x872   :  { %v1620_v47 = vpop.permute.xlu1 %1619 }
 0x873   :  { %v1622_v48 = vmul.f32 %v1620_v47, %v1605_v36 }
 0x875   :  { %1624 = vrot.lane.b32.xlu0 %v1622_v48, %s5518_s13 }
 0x8e7   :  { %v1625_v49 = vpop.permute.xlu0 %1624 }
 0x8e8   :  { %1628 = vst.msk [vmem:[#allocation8 + $0x10] sm:$0xff] %vm75_vm1, %v1625_v49  ;;  %v1631_v50 = vsel %vm75_vm1, %v1625_v49, 0 }
 0x8e9   :  { %v1702_v51 = vand.u32 4294901760, %v1631_v50 }
 0x8eb   :  { %v1703_v52 = vsub.f32 %v1631_v50, %v1702_v51  ;;  %4723 = vmatmul.mubr.f32.vlgmr.msra.gmra.mrb[18].mxu1 %v1702_v51 }
 0x8ec   :  { %5161 = vmatpush3.bf16.msra.mxu1 %v5614_v12  ;;  %4744 = vmatprep.mubr.msk.f32.mxu1 %vm5514_vm0, %v5515_v1 }
 0x8ed   :  { %v1704_v53 = vand.u32 4294901760, %v1703_v52  ;;  %5162 = vmatprep.subr.bf16.mxu1 %v5513_v0 }
 0x8ef   :  { %v1705_v54 = vsub.f32 %v1703_v52, %v1704_v53 }
 0x8f0   :  { %5164 = vmatpush3.bf16.msra.mxu1 %v5617_v18 }
 0x8f1   :  { %5171 = vmatprep.subr.bf16.mxu1 %v5513_v0  ;;  %v1706_v55 = vand.u32 4294901760, %v1705_v54 }
 0x8f3   :  { %4745 = vmatmul.mubr.f32.vlgmr.msra.gmra.mrb[20].mxu1 %v1704_v53  ;;  %4712 = vmatmul.mubr.f32.vlgmr.msra.gmra.mrb[18].mxu0 %v1706_v55 }
 0x8f4   :  { %5155 = vmatpush3.bf16.msra.mxu0 %v5622_v32  ;;  %5173 = vmatpush3.bf16.msra.mxu1 %v5614_v12 }
 0x8f5   :  { %5156 = vmatprep.subr.bf16.mxu0 %v5513_v0  ;;  %5174 = vmatprep.subr.bf16.mxu1 %v5513_v0 }
 0x8f6   :  { %4733 = vmatprep.mubr.msk.f32.mxu0 %vm5514_vm0, %v5515_v1  ;;  %4766 = vmatprep.mubr.msk.f32.mxu1 %vm5514_vm0, %v5515_v1 }
 0x8f8   :  { %5158 = vmatpush3.bf16.msra.mxu0 %v5631_v38  ;;  %5176 = vmatpush3.bf16.msra.mxu1 %v5617_v18 }
 0x8f9   :  { %5165 = vmatprep.subr.bf16.mxu0 %v5513_v0  ;;  %5183 = vmatprep.subr.bf16.mxu1 %v5513_v0 }
 0x8fb   :  { %4734 = vmatmul.mubr.f32.vlgmr.msra.gmra.mrb[20].mxu0 %v1703_v52  ;;  %4767 = vmatmul.mubr.f32.vlgmr.msra.gmra.mrb[22].mxu1 %v1702_v51 }
 0x8fc   :  { %5167 = vmatpush3.bf16.msra.mxu0 %v5639_v39  ;;  %4755 = vmatprep.mubr.msk.f32.mxu0 %vm5514_vm0, %v5515_v1 }
 0x8fd   :  { %5168 = vmatprep.subr.bf16.mxu0 %v5513_v0  ;;  %5185 = vmatpush3.bf16.msra.mxu1 %v5624_v35 }
 0x8fe   :  { %5186 = vmatprep.subr.bf16.mxu1 %v5513_v0  ;;  %4788 = vmatprep.mubr.msk.f32.mxu1 %vm5514_vm0, %v5515_v1 }
 0x900   :  { %5170 = vmatpush3.bf16.msra.mxu0 %v5645_v40 }
 0x901   :  { %5188 = vmatpush3.bf16.msra.mxu1 %v5627_v37  ;;  %5177 = vmatprep.subr.bf16.mxu0 %v5513_v0 }
 0x902   :  { %5195 = vmatprep.subr.bf16.mxu1 %v5513_v0 }
 0x903   :  { %4756 = vmatmul.mubr.f32.vlgmr.msra.gmra.mrb[22].mxu0 %v1702_v51 }
 0x904   :  { %5179 = vmatpush3.bf16.msra.mxu0 %v5614_v12  ;;  %4777 = vmatprep.mubr.msk.f32.mxu0 %vm5514_vm0, %v5515_v1 }
 0x905   :  { %5180 = vmatprep.subr.bf16.mxu0 %v5513_v0 }
 0x908   :  { %5182 = vmatpush3.bf16.msra.mxu0 %v5617_v18 }
 0x909   :  { %5189 = vmatprep.subr.bf16.mxu0 %v5513_v0 }
 0x9be   :  { %v1799_v56 = vpop.f32.mrb[18].mxu1 }
 0x9bf   :  { %v4724_v57 = vpop.f32.mrb[19].mxu1 }
 0x9c6   :  { %v1956_v58 = vpop.f32.mrb[20].mxu1  ;;  %v1708_v59 = vpop.f32.mrb[18].mxu0 }
 0x9c7   :  { %v1800_v60 = vadd.f32 %v1799_v56, %v1708_v59  ;;  %v4746_v61 = vpop.f32.mrb[21].mxu1  ;;  %v4713_v63 = vpop.f32.mrb[19].mxu0 }
 0x9ce   :  { %v1879_v2 = vpop.f32.mrb[20].mxu0  ;;  %v2114_v3 = vpop.f32.mrb[22].mxu1 }
 0x9cf   :  { %v1880_v5 = vadd.f32 %v1879_v2, %v1800_v60  ;;  %v4735_v6 = vpop.f32.mrb[21].mxu0  ;;  %v4768_v7 = vpop.f32.mrb[23].mxu1 }
 0x9d1   :  { %v1957_v8 = vadd.f32 %v1956_v58, %v1880_v5  ;;  %v2147_v58 = vld [vmem:[#allocation2 + $0x20] sm:$0xff] }
 0x9d6   :  { %v2039_v9 = vpop.f32.mrb[22].mxu0 }
 0x9d7   :  { %v2040_v10 = vadd.f32 %v2039_v9, %v1957_v8  ;;  %v4757_v11 = vpop.f32.mrb[23].mxu0 }
 0x9d9   :  { %v2115_v14 = vadd.f32 %v2114_v3, %v2040_v10 }
 0x9db   :  { %v2118_v15 = vadd.f32 %v2115_v14, %v1630_v13 }
 0x9dd   :  { %v2119_v16 = vmul.f32 %v2118_v15, %v5674_v62 }
 0x9df   :  { %5348 = vtanh.f32 %v2119_v16 }
 0x9e9   :  { %v5349_v17 = vpop.eup %5348 }
 0x9ea   :  { %v2121_v19 = vmul.f32 %v5349_v17, %v5674_v62 }
 0x9ec   :  { %v2122_v20 = vadd.f32 %v2121_v19, %v5677_v4 }
 0x9ee   :  { %2125 = vrot.lane.b32.xlu1 %v2122_v20, %s5517_s2  ;;  %v2123_v23 = vmul.f32 %v2122_v20, %v5785_v45 }
 0xa60   :  { %v2126_v21 = vpop.permute.xlu1 %2125 }
 0xa61   :  { %v2128_v22 = vmul.f32 %v2126_v21, %v2122_v20 }
 0xa63   :  { %2130 = vrot.lane.b32.xlu0 %v2128_v22, %s5518_s13 }
 0xad5   :  { %v2131_v24 = vpop.permute.xlu0 %2130 }
 0xad6   :  { %v5834_v25 = vadd.f32 %v2131_v24, %v2123_v23 }
 0xad8   :  { %5350 = vtanh.f32 %v5834_v25 }
 0xae2   :  { %v5351_v26 = vpop.eup %5350 }
 0xae3   :  { %2136 = vrot.lane.b32.xlu1 %v5351_v26, %s5517_s2 }
 0xb55   :  { %v2137_v27 = vpop.permute.xlu1 %2136 }
 0xb56   :  { %v2139_v28 = vmul.f32 %v2137_v27, %v2122_v20 }
 0xb58   :  { %2141 = vrot.lane.b32.xlu0 %v2139_v28, %s5518_s13 }
 0xbca   :  { %v2142_v29 = vpop.permute.xlu0 %2141 }
 0xbcb   :  { %2145 = vst.msk [vmem:[#allocation8 + $0x18] sm:$0xff] %vm75_vm1, %v2142_v29  ;;  %v2148_v30 = vsel %vm75_vm1, %v2142_v29, 0 }
 0xbcc   :  { %v2219_v31 = vand.u32 4294901760, %v2148_v30 }
 0xbce   :  { %v2220_v33 = vsub.f32 %v2148_v30, %v2219_v31  ;;  %4789 = vmatmul.mubr.f32.vlgmr.msra.gmra.mrb[24].mxu1 %v2219_v31 }
 0xbcf   :  { %5197 = vmatpush3.bf16.msra.mxu1 %v5614_v12  ;;  %4810 = vmatprep.mubr.msk.f32.mxu1 %vm5514_vm0, %v5515_v1 }
 0xbd0   :  { %v2221_v34 = vand.u32 4294901760, %v2220_v33  ;;  %5198 = vmatprep.subr.bf16.mxu1 %v5513_v0 }
 0xbd2   :  { %v2222_v36 = vsub.f32 %v2220_v33, %v2221_v34 }
 0xbd3   :  { %5200 = vmatpush3.bf16.msra.mxu1 %v5617_v18 }
 0xbd4   :  { %5207 = vmatprep.subr.bf16.mxu1 %v5513_v0  ;;  %v2223_v41 = vand.u32 4294901760, %v2222_v36 }
 0xbd6   :  { %4811 = vmatmul.mubr.f32.vlgmr.msra.gmra.mrb[26].mxu1 %v2221_v34  ;;  %4778 = vmatmul.mubr.f32.vlgmr.msra.gmra.mrb[24].mxu0 %v2223_v41 }
 0xbd7   :  { %5191 = vmatpush3.bf16.msra.mxu0 %v5622_v32  ;;  %5209 = vmatpush3.bf16.msra.mxu1 %v5614_v12 }
 0xbd8   :  { %5192 = vmatprep.subr.bf16.mxu0 %v5513_v0  ;;  %5210 = vmatprep.subr.bf16.mxu1 %v5513_v0 }
 0xbd9   :  { %4799 = vmatprep.mubr.msk.f32.mxu0 %vm5514_vm0, %v5515_v1  ;;  %4832 = vmatprep.mubr.msk.f32.mxu1 %vm5514_vm0, %v5515_v1 }
 0xbdb   :  { %5194 = vmatpush3.bf16.msra.mxu0 %v5631_v38  ;;  %5212 = vmatpush3.bf16.msra.mxu1 %v5617_v18 }
 0xbdc   :  { %5201 = vmatprep.subr.bf16.mxu0 %v5513_v0  ;;  %5219 = vmatprep.subr.bf16.mxu1 %v5513_v0 }
 0xbde   :  { %4800 = vmatmul.mubr.f32.vlgmr.msra.gmra.mrb[26].mxu0 %v2220_v33  ;;  %4833 = vmatmul.mubr.f32.vlgmr.msra.gmra.mrb[28].mxu1 %v2219_v31 }
 0xbdf   :  { %5203 = vmatpush3.bf16.msra.mxu0 %v5639_v39  ;;  %4821 = vmatprep.mubr.msk.f32.mxu0 %vm5514_vm0, %v5515_v1 }
 0xbe0   :  { %5204 = vmatprep.subr.bf16.mxu0 %v5513_v0  ;;  %5221 = vmatpush3.bf16.msra.mxu1 %v5624_v35 }
 0xbe1   :  { %5222 = vmatprep.subr.bf16.mxu1 %v5513_v0  ;;  %4854 = vmatprep.mubr.msk.f32.mxu1 %vm5514_vm0, %v5515_v1 }
 0xbe3   :  { %5206 = vmatpush3.bf16.msra.mxu0 %v5645_v40 }
 0xbe4   :  { %5224 = vmatpush3.bf16.msra.mxu1 %v5627_v37  ;;  %5213 = vmatprep.subr.bf16.mxu0 %v5513_v0 }
 0xbe5   :  { %5231 = vmatprep.subr.bf16.mxu1 %v5513_v0 }
 0xbe6   :  { %4822 = vmatmul.mubr.f32.vlgmr.msra.gmra.mrb[28].mxu0 %v2219_v31 }
 0xbe7   :  { %5215 = vmatpush3.bf16.msra.mxu0 %v5614_v12  ;;  %4843 = vmatprep.mubr.msk.f32.mxu0 %vm5514_vm0, %v5515_v1 }
 0xbe8   :  { %5216 = vmatprep.subr.bf16.mxu0 %v5513_v0 }
 0xbeb   :  { %5218 = vmatpush3.bf16.msra.mxu0 %v5617_v18 }
 0xbec   :  { %5225 = vmatprep.subr.bf16.mxu0 %v5513_v0 }
 0xca1   :  { %v2316_v42 = vpop.f32.mrb[24].mxu1 }
 0xca2   :  { %v4790_v43 = vpop.f32.mrb[25].mxu1 }
 0xca9   :  { %v2473_v44 = vpop.f32.mrb[26].mxu1  ;;  %v2225_v45 = vpop.f32.mrb[24].mxu0 }
 0xcaa   :  { %v2317_v46 = vadd.f32 %v2316_v42, %v2225_v45  ;;  %v4812_v47 = vpop.f32.mrb[27].mxu1  ;;  %v4779_v48 = vpop.f32.mrb[25].mxu0 }
 0xcb1   :  { %v2396_v49 = vpop.f32.mrb[26].mxu0  ;;  %v2631_v50 = vpop.f32.mrb[28].mxu1 }
 0xcb2   :  { %v2397_v51 = vadd.f32 %v2396_v49, %v2317_v46  ;;  %v4801_v52 = vpop.f32.mrb[27].mxu0  ;;  %v4834_v53 = vpop.f32.mrb[29].mxu1 }
 0xcb4   :  { %v2474_v54 = vadd.f32 %v2473_v44, %v2397_v51  ;;  %v2664_v44 = vld [vmem:[#allocation2 + $0x28] sm:$0xff] }
 0xcb9   :  { %v2556_v55 = vpop.f32.mrb[28].mxu0 }
 0xcba   :  { %v2557_v56 = vadd.f32 %v2556_v55, %v2474_v54  ;;  %v4823_v57 = vpop.f32.mrb[29].mxu0 }
 0xcbc   :  { %v2632_v59 = vadd.f32 %v2631_v50, %v2557_v56 }
 0xcbe   :  { %v2635_v60 = vadd.f32 %v2632_v59, %v2147_v58 }
 0xcc0   :  { %v2636_v61 = vmul.f32 %v2635_v60, %v5674_v62 }
 0xcc2   :  { %5352 = vtanh.f32 %v2636_v61 }
 0xccc   :  { %v5353_v63 = vpop.eup %5352 }
 0xccd   :  { %v2638_v2 = vmul.f32 %v5353_v63, %v5674_v62 }
 0xccf   :  { %v2639_v3 = vadd.f32 %v2638_v2, %v5677_v4 }
 0xcd1   :  { %2642 = vrot.lane.b32.xlu1 %v2639_v3, %s5517_s2  ;;  %v2640_v7 = vmul.f32 %v2639_v3, %v5834_v25 }
 0xd43   :  { %v2643_v5 = vpop.permute.xlu1 %2642 }
 0xd44   :  { %v2645_v6 = vmul.f32 %v2643_v5, %v2639_v3 }
 0xd46   :  { %2647 = vrot.lane.b32.xlu0 %v2645_v6, %s5518_s13 }
 0xdb8   :  { %v2648_v8 = vpop.permute.xlu0 %2647 }
 0xdb9   :  { %v5883_v9 = vadd.f32 %v2648_v8, %v2640_v7 }
 0xdbb   :  { %5354 = vtanh.f32 %v5883_v9 }
 0xdc5   :  { %v5355_v10 = vpop.eup %5354 }
 0xdc6   :  { %2653 = vrot.lane.b32.xlu1 %v5355_v10, %s5517_s2 }
 0xe38   :  { %v2654_v11 = vpop.permute.xlu1 %2653 }
 0xe39   :  { %v2656_v13 = vmul.f32 %v2654_v11, %v2639_v3 }
 0xe3b   :  { %2658 = vrot.lane.b32.xlu0 %v2656_v13, %s5518_s13 }
 0xead   :  { %v2659_v14 = vpop.permute.xlu0 %2658 }
 0xeae   :  { %2662 = vst.msk [vmem:[#allocation8 + $0x20] sm:$0xff] %vm75_vm1, %v2659_v14  ;;  %v2665_v15 = vsel %vm75_vm1, %v2659_v14, 0 }
 0xeaf   :  { %v2736_v16 = vand.u32 4294901760, %v2665_v15 }
 0xeb1   :  { %v2737_v17 = vsub.f32 %v2665_v15, %v2736_v16  ;;  %4855 = vmatmul.mubr.f32.vlgmr.msra.gmra.mrb[30].mxu1 %v2736_v16 }
 0xeb2   :  { %5233 = vmatpush3.bf16.msra.mxu1 %v5614_v12  ;;  %4876 = vmatprep.mubr.msk.f32.mxu1 %vm5514_vm0, %v5515_v1 }
 0xeb3   :  { %v2738_v19 = vand.u32 4294901760, %v2737_v17  ;;  %5234 = vmatprep.subr.bf16.mxu1 %v5513_v0 }
 0xeb5   :  { %v2739_v20 = vsub.f32 %v2737_v17, %v2738_v19 }
 0xeb6   :  { %5236 = vmatpush3.bf16.msra.mxu1 %v5617_v18 }
 0xeb7   :  { %5243 = vmatprep.subr.bf16.mxu1 %v5513_v0  ;;  %v2740_v21 = vand.u32 4294901760, %v2739_v20 }
 0xeb9   :  { %4877 = vmatmul.mubr.f32.vlgmr.msra.gmra.mrb[32].mxu1 %v2738_v19  ;;  %4844 = vmatmul.mubr.f32.vlgmr.msra.gmra.mrb[30].mxu0 %v2740_v21 }
 0xeba   :  { %5227 = vmatpush3.bf16.msra.mxu0 %v5622_v32  ;;  %5245 = vmatpush3.bf16.msra.mxu1 %v5614_v12 }
 0xebb   :  { %5228 = vmatprep.subr.bf16.mxu0 %v5513_v0  ;;  %5246 = vmatprep.subr.bf16.mxu1 %v5513_v0 }
 0xebc   :  { %4865 = vmatprep.mubr.msk.f32.mxu0 %vm5514_vm0, %v5515_v1  ;;  %4898 = vmatprep.mubr.msk.f32.mxu1 %vm5514_vm0, %v5515_v1 }
 0xebe   :  { %5230 = vmatpush3.bf16.msra.mxu0 %v5631_v38  ;;  %5248 = vmatpush3.bf16.msra.mxu1 %v5617_v18 }
 0xebf   :  { %5237 = vmatprep.subr.bf16.mxu0 %v5513_v0  ;;  %5255 = vmatprep.subr.bf16.mxu1 %v5513_v0 }
 0xec1   :  { %4866 = vmatmul.mubr.f32.vlgmr.msra.gmra.mrb[32].mxu0 %v2737_v17  ;;  %4899 = vmatmul.mubr.f32.vlgmr.msra.gmra.mrb[34].mxu1 %v2736_v16 }
 0xec2   :  { %5239 = vmatpush3.bf16.msra.mxu0 %v5639_v39  ;;  %4887 = vmatprep.mubr.msk.f32.mxu0 %vm5514_vm0, %v5515_v1 }
 0xec3   :  { %5240 = vmatprep.subr.bf16.mxu0 %v5513_v0  ;;  %5257 = vmatpush3.bf16.msra.mxu1 %v5624_v35 }
 0xec4   :  { %5258 = vmatprep.subr.bf16.mxu1 %v5513_v0  ;;  %4920 = vmatprep.mubr.msk.f32.mxu1 %vm5514_vm0, %v5515_v1 }
 0xec6   :  { %5242 = vmatpush3.bf16.msra.mxu0 %v5645_v40 }
 0xec7   :  { %5260 = vmatpush3.bf16.msra.mxu1 %v5627_v37  ;;  %5249 = vmatprep.subr.bf16.mxu0 %v5513_v0 }
 0xec8   :  { %5267 = vmatprep.subr.bf16.mxu1 %v5513_v0 }
 0xec9   :  { %4888 = vmatmul.mubr.f32.vlgmr.msra.gmra.mrb[34].mxu0 %v2736_v16 }
 0xeca   :  { %5251 = vmatpush3.bf16.msra.mxu0 %v5614_v12  ;;  %4909 = vmatprep.mubr.msk.f32.mxu0 %vm5514_vm0, %v5515_v1 }
 0xecb   :  { %5252 = vmatprep.subr.bf16.mxu0 %v5513_v0 }
 0xece   :  { %5254 = vmatpush3.bf16.msra.mxu0 %v5617_v18 }
 0xecf   :  { %5261 = vmatprep.subr.bf16.mxu0 %v5513_v0 }
 0xf84   :  { %v2833_v22 = vpop.f32.mrb[30].mxu1 }
 0xf85   :  { %v4856_v23 = vpop.f32.mrb[31].mxu1 }
 0xf8c   :  { %v2990_v24 = vpop.f32.mrb[32].mxu1  ;;  %v2742_v25 = vpop.f32.mrb[30].mxu0 }
 0xf8d   :  { %v2834_v26 = vadd.f32 %v2833_v22, %v2742_v25  ;;  %v4878_v27 = vpop.f32.mrb[33].mxu1  ;;  %v4845_v28 = vpop.f32.mrb[31].mxu0  ;;  %v3181_v22 = vld [vmem:[#allocation2 + $0x30] sm:$0xff] }
 0xf94   :  { %v2913_v29 = vpop.f32.mrb[32].mxu0  ;;  %v3148_v30 = vpop.f32.mrb[34].mxu1 }
 0xf95   :  { %v2914_v31 = vadd.f32 %v2913_v29, %v2834_v26  ;;  %v4867_v33 = vpop.f32.mrb[33].mxu0  ;;  %v4900_v34 = vpop.f32.mrb[35].mxu1 }
 0xf97   :  { %v2991_v36 = vadd.f32 %v2990_v24, %v2914_v31 }
 0xf9c   :  { %v3073_v41 = vpop.f32.mrb[34].mxu0 }
 0xf9d   :  { %v3074_v42 = vadd.f32 %v3073_v41, %v2991_v36  ;;  %v4889_v43 = vpop.f32.mrb[35].mxu0 }
 0xf9f   :  { %v3149_v45 = vadd.f32 %v3148_v30, %v3074_v42 }
 0xfa1   :  { %v3152_v46 = vadd.f32 %v3149_v45, %v2664_v44 }
 0xfa3   :  { %v3153_v47 = vmul.f32 %v3152_v46, %v5674_v62 }
 0xfa5   :  { %5356 = vtanh.f32 %v3153_v47 }
 0xfaf   :  { %v5357_v48 = vpop.eup %5356 }
 0xfb0   :  { %v3155_v49 = vmul.f32 %v5357_v48, %v5674_v62 }
 0xfb2   :  { %v3156_v50 = vadd.f32 %v3155_v49, %v5677_v4 }
 0xfb4   :  { %3159 = vrot.lane.b32.xlu1 %v3156_v50, %s5517_s2  ;;  %v3157_v53 = vmul.f32 %v3156_v50, %v5883_v9 }
0x1026   :  { %v3160_v51 = vpop.permute.xlu1 %3159 }
0x1027   :  { %v3162_v52 = vmul.f32 %v3160_v51, %v3156_v50 }
0x1029   :  { %3164 = vrot.lane.b32.xlu0 %v3162_v52, %s5518_s13 }
0x109b   :  { %v3165_v54 = vpop.permute.xlu0 %3164 }
0x109c   :  { %v5932_v55 = vadd.f32 %v3165_v54, %v3157_v53 }
0x109e   :  { %5358 = vtanh.f32 %v5932_v55 }
0x10a8   :  { %v5359_v56 = vpop.eup %5358 }
0x10a9   :  { %3170 = vrot.lane.b32.xlu1 %v5359_v56, %s5517_s2 }
0x111b   :  { %v3171_v57 = vpop.permute.xlu1 %3170 }
0x111c   :  { %v3173_v58 = vmul.f32 %v3171_v57, %v3156_v50 }
0x111e   :  { %3175 = vrot.lane.b32.xlu0 %v3173_v58, %s5518_s13 }
0x1190   :  { %v3176_v59 = vpop.permute.xlu0 %3175 }
0x1191   :  { %3179 = vst.msk [vmem:[#allocation8 + $0x28] sm:$0xff] %vm75_vm1, %v3176_v59  ;;  %v3182_v60 = vsel %vm75_vm1, %v3176_v59, 0 }
0x1192   :  { %v3253_v61 = vand.u32 4294901760, %v3182_v60 }
0x1194   :  { %v3254_v63 = vsub.f32 %v3182_v60, %v3253_v61  ;;  %4921 = vmatmul.mubr.f32.vlgmr.msra.gmra.mrb[36].mxu1 %v3253_v61 }
0x1195   :  { %5269 = vmatpush3.bf16.msra.mxu1 %v5614_v12  ;;  %4942 = vmatprep.mubr.msk.f32.mxu1 %vm5514_vm0, %v5515_v1 }
0x1196   :  { %v3255_v2 = vand.u32 4294901760, %v3254_v63  ;;  %5270 = vmatprep.subr.bf16.mxu1 %v5513_v0 }
0x1198   :  { %v3256_v3 = vsub.f32 %v3254_v63, %v3255_v2 }
0x1199   :  { %5272 = vmatpush3.bf16.msra.mxu1 %v5617_v18 }
0x119a   :  { %5279 = vmatprep.subr.bf16.mxu1 %v5513_v0  ;;  %v3257_v5 = vand.u32 4294901760, %v3256_v3 }
0x119c   :  { %4943 = vmatmul.mubr.f32.vlgmr.msra.gmra.mrb[38].mxu1 %v3255_v2  ;;  %4910 = vmatmul.mubr.f32.vlgmr.msra.gmra.mrb[36].mxu0 %v3257_v5 }
0x119d   :  { %5263 = vmatpush3.bf16.msra.mxu0 %v5622_v32  ;;  %5281 = vmatpush3.bf16.msra.mxu1 %v5614_v12 }
0x119e   :  { %5264 = vmatprep.subr.bf16.mxu0 %v5513_v0  ;;  %5282 = vmatprep.subr.bf16.mxu1 %v5513_v0 }
0x119f   :  { %4931 = vmatprep.mubr.msk.f32.mxu0 %vm5514_vm0, %v5515_v1  ;;  %4964 = vmatprep.mubr.msk.f32.mxu1 %vm5514_vm0, %v5515_v1 }
0x11a1   :  { %5266 = vmatpush3.bf16.msra.mxu0 %v5631_v38  ;;  %5284 = vmatpush3.bf16.msra.mxu1 %v5617_v18 }
0x11a2   :  { %5273 = vmatprep.subr.bf16.mxu0 %v5513_v0  ;;  %5291 = vmatprep.subr.bf16.mxu1 %v5513_v0 }
0x11a4   :  { %4932 = vmatmul.mubr.f32.vlgmr.msra.gmra.mrb[38].mxu0 %v3254_v63  ;;  %4965 = vmatmul.mubr.f32.vlgmr.msra.gmra.mrb[40].mxu1 %v3253_v61 }
0x11a5   :  { %5275 = vmatpush3.bf16.msra.mxu0 %v5639_v39  ;;  %4953 = vmatprep.mubr.msk.f32.mxu0 %vm5514_vm0, %v5515_v1 }
0x11a6   :  { %5276 = vmatprep.subr.bf16.mxu0 %v5513_v0  ;;  %5293 = vmatpush3.bf16.msra.mxu1 %v5624_v35 }
0x11a7   :  { %5294 = vmatprep.subr.bf16.mxu1 %v5513_v0  ;;  %4986 = vmatprep.mubr.msk.f32.mxu1 %vm5514_vm0, %v5515_v1 }
0x11a9   :  { %5278 = vmatpush3.bf16.msra.mxu0 %v5645_v40 }
0x11aa   :  { %5296 = vmatpush3.bf16.msra.mxu1 %v5627_v37  ;;  %5285 = vmatprep.subr.bf16.mxu0 %v5513_v0 }
0x11ab   :  { %5303 = vmatprep.subr.bf16.mxu1 %v5513_v0 }
0x11ac   :  { %4954 = vmatmul.mubr.f32.vlgmr.msra.gmra.mrb[40].mxu0 %v3253_v61 }
0x11ad   :  { %5287 = vmatpush3.bf16.msra.mxu0 %v5614_v12  ;;  %4975 = vmatprep.mubr.msk.f32.mxu0 %vm5514_vm0, %v5515_v1 }
0x11ae   :  { %5288 = vmatprep.subr.bf16.mxu0 %v5513_v0 }
0x11b1   :  { %5290 = vmatpush3.bf16.msra.mxu0 %v5617_v18 }
0x11b2   :  { %5297 = vmatprep.subr.bf16.mxu0 %v5513_v0 }
0x1267   :  { %v3350_v35 = vpop.f32.mrb[36].mxu1 }
0x1268   :  { %v4922_v6 = vpop.f32.mrb[37].mxu1 }
0x126f   :  { %v3507_v7 = vpop.f32.mrb[38].mxu1  ;;  %v3259_v37 = vpop.f32.mrb[36].mxu0 }
0x1270   :  { %v3351_v8 = vadd.f32 %v3350_v35, %v3259_v37  ;;  %v4944_v9 = vpop.f32.mrb[39].mxu1  ;;  %v4911_v10 = vpop.f32.mrb[37].mxu0 }
0x1277   :  { %v3430_v11 = vpop.f32.mrb[38].mxu0  ;;  %v3665_v13 = vpop.f32.mrb[40].mxu1 }
0x1278   :  { %v3431_v14 = vadd.f32 %v3430_v11, %v3351_v8  ;;  %v4933_v15 = vpop.f32.mrb[39].mxu0  ;;  %v4966_v16 = vpop.f32.mrb[41].mxu1 }
0x127a   :  { %v3508_v17 = vadd.f32 %v3507_v7, %v3431_v14 }
0x127f   :  { %v3590_v19 = vpop.f32.mrb[40].mxu0 }
0x1280   :  { %v3591_v20 = vadd.f32 %v3590_v19, %v3508_v17  ;;  %v4955_v21 = vpop.f32.mrb[41].mxu0 }
0x1282   :  { %v3666_v23 = vadd.f32 %v3665_v13, %v3591_v20 }
0x1284   :  { %v3669_v24 = vadd.f32 %v3666_v23, %v3181_v22 }
0x1286   :  { %v3670_v25 = vmul.f32 %v3669_v24, %v5674_v62 }
0x1288   :  { %5360 = vtanh.f32 %v3670_v25 }
0x1292   :  { %v5361_v26 = vpop.eup %5360 }
0x1293   :  { %v3672_v27 = vmul.f32 %v5361_v26, %v5674_v62 }
0x1295   :  { %v3673_v28 = vadd.f32 %v3672_v27, %v5677_v4 }
0x1297   :  { %3676 = vrot.lane.b32.xlu1 %v3673_v28, %s5517_s2  ;;  %v3674_v31 = vmul.f32 %v3673_v28, %v5932_v55 }
0x1309   :  { %v3677_v29 = vpop.permute.xlu1 %3676 }
0x130a   :  { %v3679_v30 = vmul.f32 %v3677_v29, %v3673_v28 }
0x130c   :  { %3681 = vrot.lane.b32.xlu0 %v3679_v30, %s5518_s13 }
0x137e   :  { %v3682_v33 = vpop.permute.xlu0 %3681 }
0x137f   :  { %v5981_v34 = vadd.f32 %v3682_v33, %v3674_v31 }
0x1381   :  { %5362 = vtanh.f32 %v5981_v34 }
0x138b   :  { %v5363_v36 = vpop.eup %5362 }
0x138c   :  { %3687 = vrot.lane.b32.xlu1 %v5363_v36, %s5517_s2 }
0x13fe   :  { %v3688_v41 = vpop.permute.xlu1 %3687 }
0x13ff   :  { %v3690_v42 = vmul.f32 %v3688_v41, %v3673_v28 }
0x1401   :  { %3692 = vrot.lane.b32.xlu0 %v3690_v42, %s5518_s13 }
0x1473   :  { %v3693_v43 = vpop.permute.xlu0 %3692 }
0x1474   :  { %3696 = vst.msk [vmem:[#allocation8 + $0x30] sm:$0xff] %vm75_vm1, %v3693_v43  ;;  %v3699_v44 = vsel %vm75_vm1, %v3693_v43, 0 }
0x1475   :  { %v3770_v45 = vand.u32 4294901760, %v3699_v44 }
0x1477   :  { %v3771_v46 = vsub.f32 %v3699_v44, %v3770_v45  ;;  %4987 = vmatmul.mubr.f32.vlgmr.msra.gmra.mrb[42].mxu1 %v3770_v45 }
0x1478   :  { %5305 = vmatpush3.bf16.msra.mxu1 %v5614_v12  ;;  %5008 = vmatprep.mubr.msk.f32.mxu1 %vm5514_vm0, %v5515_v1 }
0x1479   :  { %v3772_v47 = vand.u32 4294901760, %v3771_v46  ;;  %5306 = vmatprep.subr.bf16.mxu1 %v5513_v0 }
0x147b   :  { %v3773_v48 = vsub.f32 %v3771_v46, %v3772_v47 }
0x147c   :  { %5308 = vmatpush3.bf16.msra.mxu1 %v5617_v18 }
0x147d   :  { %5315 = vmatprep.subr.bf16.mxu1 %v5513_v0  ;;  %v3774_v49 = vand.u32 4294901760, %v3773_v48 }
0x147f   :  { %5009 = vmatmul.mubr.f32.vlgmr.msra.gmra.mrb[44].mxu1 %v3772_v47  ;;  %4976 = vmatmul.mubr.f32.vlgmr.msra.gmra.mrb[42].mxu0 %v3774_v49 }
0x1480   :  { %5299 = vmatpush3.bf16.msra.mxu0 %v5622_v32  ;;  %5317 = vmatpush3.bf16.msra.mxu1 %v5614_v12 }
0x1481   :  { %5300 = vmatprep.subr.bf16.mxu0 %v5513_v0  ;;  %5318 = vmatprep.subr.bf16.mxu1 %v5513_v0 }
0x1482   :  { %4997 = vmatprep.mubr.msk.f32.mxu0 %vm5514_vm0, %v5515_v1  ;;  %5030 = vmatprep.mubr.msk.f32.mxu1 %vm5514_vm0, %v5515_v1 }
0x1484   :  { %5302 = vmatpush3.bf16.msra.mxu0 %v5631_v38  ;;  %5320 = vmatpush3.bf16.msra.mxu1 %v5617_v18 }
0x1485   :  { %5309 = vmatprep.subr.bf16.mxu0 %v5513_v0 }
0x1487   :  { %4998 = vmatmul.mubr.f32.vlgmr.msra.gmra.mrb[44].mxu0 %v3771_v46  ;;  %5031 = vmatmul.mubr.f32.vlgmr.msra.gmra.mrb[46].mxu1 %v3770_v45 }
0x1488   :  { %5311 = vmatpush3.bf16.msra.mxu0 %v5639_v39  ;;  %5019 = vmatprep.mubr.msk.f32.mxu0 %vm5514_vm0, %v5515_v1 }
0x1489   :  { %5312 = vmatprep.subr.bf16.mxu0 %v5513_v0  ;;  %v3698_v0 = vld [vmem:[#allocation2 + $0x38] sm:$0xff] }
0x148c   :  { %5314 = vmatpush3.bf16.msra.mxu0 %v5645_v40 }
0x148f   :  { %5020 = vmatmul.mubr.f32.vlgmr.msra.gmra.mrb[46].mxu0 %v3770_v45 }
0x154a   :  { %v3867_v12 = vpop.f32.mrb[42].mxu1 }
0x154b   :  { %v4988_v32 = vpop.f32.mrb[43].mxu1 }
0x1552   :  { %v4024_v50 = vpop.f32.mrb[44].mxu1  ;;  %v3776_v38 = vpop.f32.mrb[42].mxu0 }
0x1553   :  { %v3868_v51 = vadd.f32 %v3867_v12, %v3776_v38  ;;  %v5010_v18 = vpop.f32.mrb[45].mxu1  ;;  %v4977_v52 = vpop.f32.mrb[43].mxu0 }
0x155a   :  { %v3947_v53 = vpop.f32.mrb[44].mxu0  ;;  %v4182_v54 = vpop.f32.mrb[46].mxu1 }
0x155b   :  { %v3948_v55 = vadd.f32 %v3947_v53, %v3868_v51  ;;  %v4999_v56 = vpop.f32.mrb[45].mxu0  ;;  %v5032_v39 = vpop.f32.mrb[47].mxu1 }
0x155d   :  { %v4025_v57 = vadd.f32 %v4024_v50, %v3948_v55 }
0x1562   :  { %v4107_v58 = vpop.f32.mrb[46].mxu0 }
0x1563   :  { %v4108_v1 = vadd.f32 %v4107_v58, %v4025_v57  ;;  %v5021_v59 = vpop.f32.mrb[47].mxu0 }
0x1565   :  { %v4183_v60 = vadd.f32 %v4182_v54, %v4108_v1 }
0x1567   :  { %v4186_v40 = vadd.f32 %v4183_v60, %v3698_v0 }
0x1569   :  { %v4187_v61 = vmul.f32 %v4186_v40, %v5674_v62 }
0x156b   :  { %5364 = vtanh.f32 %v4187_v61 }
0x1575   :  { %v5365_v63 = vpop.eup %5364 }
0x1576   :  { %v4189_v2 = vmul.f32 %v5365_v63, %v5674_v62 }
0x1578   :  { %v4190_v3 = vadd.f32 %v4189_v2, %v5677_v4 }
0x157a   :  { %4193 = vrot.lane.b32.xlu1 %v4190_v3, %s5517_s2  ;;  %v4191_v6 = vmul.f32 %v4190_v3, %v5981_v34 }
0x15ec   :  { %v4194_v5 = vpop.permute.xlu1 %4193 }
0x15ed   :  { %v4196_v35 = vmul.f32 %v4194_v5, %v4190_v3 }
0x15ef   :  { %4198 = vrot.lane.b32.xlu0 %v4196_v35, %s5518_s13 }
0x1661   :  { %v4199_v7 = vpop.permute.xlu0 %4198 }
0x1662   :  { %v4201_v37 = vadd.f32 %v4199_v7, %v4191_v6 }
0x1664   :  { %5366 = vtanh.f32 %v4201_v37 }
0x166e   :  { %v5367_v8 = vpop.eup %5366 }
0x166f   :  { %4204 = vrot.lane.b32.xlu1 %v5367_v8, %s5517_s2 }
0x1673   :  { %4216 = vrot.lane.b32.xlu1 %v4201_v37, %s5519_s3 }
0x16e1   :  { %v4205_v9 = vpop.permute.xlu1 %4204 }
0x16e2   :  { %v4207_v62 = vmul.f32 %v4205_v9, %v4190_v3 }
0x16e4   :  { %4209 = vrot.lane.b32.xlu0 %v4207_v62, %s5518_s13 }
0x16e5   :  { %v4217_v4 = vpop.permute.xlu1 %4216 }
0x16e6   :  { %4219 = vst.msk [vmem:[#allocation11] sm:$0xff] %vm75_vm1, %v4217_v4 }
0x1756   :  { %v4210_v10 = vpop.permute.xlu0 %4209 }
0x1757   :  { %4213 = vst.msk [vmem:[#allocation8 + $0x38] sm:$0xff] %vm75_vm1, %v4210_v10  ;;  %4214 = vst.msk [vmem:[#allocation9] sm:$0xff] %vm75_vm1, %v4210_v10 }
0x1758   :  { %5445 = shalt.err (!%p5442_p0)
}
0x1759   :  { %s5446_s22 = scalar_lea.hbm %s6079_s5, 128 }
0x175a   :  { %p5447_p1 = scmp.ne.s32.totalorder %s6079_s5, %s5446_s22  ;;  %p5450_p2 = scmp.lt.u32.totalorder %s5446_s22, %s6079_s5 }
0x175c   :  { %p5452_p3 = pnand %p5450_p2, %p5447_p1 }
0x175e   :  { %5455 = shalt.err (!%p5452_p3)
}
0x175f   :  { %4241 = dma.vmem_to_hbm [thread:$0]  %s4239_s15, 128, %s6079_s5, [#allocation10]  }
0x1760   :  { %s5456_s30 = scalar_lea.vmem %s6019_s17, 1024  ;;  %p5461_p5 = scmp.lt.s32.totalorder %s6019_s17, %s6019_s17 }
0x1761   :  { %p5457_p4 = scmp.ne.s32.totalorder %s6019_s17, %s5456_s30  ;;  %p5462_p6 = scmp.lt.s32.totalorder %s5456_s30, %s5456_s30 }
0x1763   :  { %p5463_p7 = por %p5462_p6, %p5461_p5 }
0x1765   :  { %p5464_p8 = pnand %p5463_p7, %p5457_p4 }
0x1767   :  { %5467 = shalt.err (!%p5464_p8)
}
0x1768   :  { %s5468_s0 = scalar_lea.hbm %s6078_s4, 1024 }
0x1769   :  { %p5469_p9 = scmp.ne.s32.totalorder %s6078_s4, %s5468_s0  ;;  %p5472_p10 = scmp.lt.u32.totalorder %s5468_s0, %s6078_s4 }
0x176b   :  { %p5474_p11 = pnand %p5472_p10, %p5469_p9 }
0x176d   :  { %5477 = shalt.err (!%p5474_p11)
}
0x176e   :  { %4231 = dma.vmem_to_hbm [thread:$0]  %s6019_s17, 1024, %s6078_s4, [#allocation4], %s5510_s9, %s5510_s9, %s5511_s10  }
0x176f   :  { %s5478_s3 = scalar_lea.vmem %s6023_s19, 128  ;;  %p5483_p13 = scmp.lt.s32.totalorder %s6023_s19, %s6023_s19 }
0x1770   :  { %p5479_p12 = scmp.ne.s32.totalorder %s6023_s19, %s5478_s3  ;;  %p5484_p0 = scmp.lt.s32.totalorder %s5478_s3, %s5478_s3 }
0x1772   :  { %p5485_p1 = por %p5484_p0, %p5483_p13 }
0x1774   :  { %p5486_p2 = pnand %p5485_p1, %p5479_p12 }
0x1776   :  { %5489 = shalt.err (!%p5486_p2)
}
0x1777   :  { %s5490_s16 = scalar_lea.hbm %s6080_s6, 128 }
0x1778   :  { %p5491_p3 = scmp.ne.s32.totalorder %s6080_s6, %s5490_s16  ;;  %p5494_p4 = scmp.lt.u32.totalorder %s5490_s16, %s6080_s6 }
0x177a   :  { %p5496_p5 = pnand %p5494_p4, %p5491_p3 }
0x177c   :  { %5499 = shalt.err (!%p5496_p5)
}
0x177d   :  { %4251 = dma.vmem_to_hbm [thread:$0]  %s6023_s19, 128, %s6080_s6, [#allocation10]  }
0x177e   :  { %5504 = dma.done.wait [#allocation4], 1024  }
0x177f   :  { %5505 = vsyncadd [#allocation4], 4294966272 }
0x1780   :  { %5506 = dma.done.wait [#allocation10], 256  }
0x1781   :  { %5507 = vsyncadd [#allocation10], 4294967040 }
0x1782   :  { %4261 = vsyncpa [#allocation3], 1 }
0x1783   :  { %4262 = vsyncpa [#allocation6], 1 }
0x1784   :  { %4263 = vsyncpa [#allocation4], 1 }
0x1785   :  { %4264 = vsyncpa [#allocation10], 1 }

</bundles_post_ra>
